<compile_context>
chip_gen: v6e
topology: v6e:2x2x1
jax: 0.10.0
libtpu: 0.0.40
codegen_flags: <defaults>
</compile_context>

<pallas_src>
import math

import jax
import jax.numpy as jnp
from jax.experimental import pallas as pl
from jax.experimental.pallas import tpu as pltpu


# --------------------------------------------------------------------------
# Budgets / tiling helpers
# --------------------------------------------------------------------------

_BLOCK_BUDGET_BYTES = 4 * 1024 * 1024   # per-buffer budget; in+out x double-buffer
                                        # ~= 16 MiB, comfortably inside v7x's 64 MiB
_VMEM_LIMIT_BYTES = 48 * 1024 * 1024    # explicit scoped-VMEM ceiling: above v5e's
                                        # 16 MiB default, below v7x's 64 MiB physical


def _round_up(x, m):
    return (x + m - 1) // m * m


def _sublane(itemsize):
    # Sublane packing granularity: 8 for 32-bit, 16 for 16-bit, 32 for 8-bit.
    return max(8, 32 // itemsize)


def _pick_row_tile(M, C, itemsize):
    """Row tile for the (M, C) last-dim path. Block is (tm, C), C fully resident."""
    c_lanes = _round_up(C, 128)                      # physical lanes of the last dim
    rows = (_BLOCK_BUDGET_BYTES // (c_lanes * itemsize)) // 8 * 8
    if rows <= 0:
        # TODO(synk): vocab-scale C (a full (8, C) row-group exceeding the budget)
        # would need a two-pass / online-softmax fallback with the C axis tiled
        # on an "arbitrary" grid axis; not needed for this module's use.
        rows = 8
    if M <= rows:
        return M            # single block; "equals full dim" satisfies the (8,128) rule
    return max(8, rows)     # multiple of 8; final partial block is masked


def _pick_inner_tiles(P, C, S, itemsize):
    """Tiles for the (P, C, S) inner-dim path. Block is (tp, C, tl), lane-dense."""
    c_phys = _round_up(C, _sublane(itemsize))        # physical sublanes of the C dim
    max_lanes = max(128, (_BLOCK_BUDGET_BYTES // (c_phys * itemsize)) // 128 * 128)
    tl = S if S <= max_lanes else max_lanes          # full dim, or multiple of 128
    slice_bytes = c_phys * _round_up(tl, 128) * itemsize
    tp = max(1, min(P, _BLOCK_BUDGET_BYTES // max(slice_bytes, 1)))
    return tp, tl


def _cost_estimate(n_elems, itemsize):
    # max, sub, exp(arg prep), sum, mul ~ 5 flops/elem; 1 transcendental/elem;
    # one read + one write of the array.
    return pl.CostEstimate(flops=5 * n_elems,
                           transcendentals=n_elems,
                           bytes_accessed=2 * n_elems * itemsize)


# --------------------------------------------------------------------------
# Kernels
# --------------------------------------------------------------------------

def _softmax_lastdim_kernel(x_ref, o_ref):
    """Softmax over the last (lane) axis of a (tm, C) block; C fully resident."""
    x = x_ref[...].astype(jnp.float32)
    m = jnp.max(x, axis=-1, keepdims=True)
    e = jnp.exp(x - m)
    s = jnp.sum(e, axis=-1, keepdims=True)
    r = pl.reciprocal(s, approx=True)        # EUP slot
    r = r * (2.0 - s * r)                    # one Newton step -> ~f32-exact normalisation
    o_ref[...] = (e * r).astype(o_ref.dtype)


def _softmax_inner_kernel(x_ref, o_ref):
    """Softmax over axis 1 (sublanes) of a (tp, C, tl) block; lanes stay dense."""
    x = x_ref[...].astype(jnp.float32)
    m = jnp.max(x, axis=1, keepdims=True)
    e = jnp.exp(x - m)
    s = jnp.sum(e, axis=1, keepdims=True)
    r = pl.reciprocal(s, approx=True)
    r = r * (2.0 - s * r)
    o_ref[...] = (e * r).astype(o_ref.dtype)


# --------------------------------------------------------------------------
# Wrappers
# --------------------------------------------------------------------------

def _softmax_over_last_axis(x2):
    """x2: (M, C); softmax over axis -1 with a row-tiled grid (no pad/slice)."""
    M, C = x2.shape
    itemsize = x2.dtype.itemsize
    tm = _pick_row_tile(M, C, itemsize)
    # TODO(synk): dim=-1 with tiny C (< ~16) keeps (tm, C) blocks (lane-sparse,
    # masked stores); a segmented lane-dense repack would help such callers.
    # revunet_3D itself calls softmax with dim=1, which takes the lane-dense
    # inner-axis path below.
    return pl.pallas_call(
        _softmax_lastdim_kernel,
        out_shape=jax.ShapeDtypeStruct((M, C), x2.dtype),
        grid=(pl.cdiv(M, tm),),
        in_specs=[pl.BlockSpec((tm, C), lambda i: (i, 0))],
        out_specs=pl.BlockSpec((tm, C), lambda i: (i, 0)),
        compiler_params=pltpu.CompilerParams(
            dimension_semantics=("parallel",),
            vmem_limit_bytes=_VMEM_LIMIT_BYTES),
        cost_estimate=_cost_estimate(x2.size, itemsize),
    )(x2)


def _softmax_over_inner_axis(x3):
    """x3: (P, C, S); softmax over axis 1.

    The (large) trailing axis lives in the 128-lane dimension and the softmax
    reduction runs across sublanes, so every load/store is lane-dense even for
    tiny channel counts (C = 2..16).  Leading P slices are folded into the
    block up to the per-buffer budget; no transposes, no padding.
    """
    P, C, S = x3.shape
    itemsize = x3.dtype.itemsize
    tp, tl = _pick_inner_tiles(P, C, S, itemsize)
    return pl.pallas_call(
        _softmax_inner_kernel,
        out_shape=jax.ShapeDtypeStruct((P, C, S), x3.dtype),
        grid=(pl.cdiv(P, tp), pl.cdiv(S, tl)),
        in_specs=[pl.BlockSpec((tp, C, tl), lambda p, j: (p, 0, j))],
        out_specs=pl.BlockSpec((tp, C, tl), lambda p, j: (p, 0, j)),
        compiler_params=pltpu.CompilerParams(
            dimension_semantics=("parallel", "parallel"),
            vmem_limit_bytes=_VMEM_LIMIT_BYTES),
        cost_estimate=_cost_estimate(x3.size, itemsize),
    )(x3)


def pallas_softmax(x, dim):
    """Equivalent of torch.nn.functional.softmax(x, dim) via Pallas TPU kernels."""
    nd = x.ndim
    dim = dim % nd
    shape = x.shape
    if dim == nd - 1:
        C = shape[-1]
        M = math.prod(shape[:-1]) if nd > 1 else 1
        out = _softmax_over_last_axis(x.reshape(M, C))
        return out.reshape(shape)
    # Softmax over a non-minor axis: fold leading dims into P, trailing into S.
    P = math.prod(shape[:dim]) if dim > 0 else 1
    C = shape[dim]
    S = math.prod(shape[dim + 1:])
    out = _softmax_over_inner_axis(x.reshape(P, C, S))
    return out.reshape(shape)


class softmax:
    """Pallas counterpart of the PyTorch `softmax` nn.Module."""

    def __init__(self, dim):
        self.dim = dim

    def __call__(self, x):
        return pallas_softmax(x, self.dim)


# --------------------------------------------------------------------------
# Main
# --------------------------------------------------------------------------

if __name__ == "__main__":
    key = jax.random.PRNGKey(0)
    k1, k2, k3 = jax.random.split(key, 3)

    # Case 1: channel softmax on an NCDHW segmentation volume (how revunet_3D
    # uses this module: dim=1, tiny C).  Lane-dense inner path, P folded in.
    x1 = jax.random.normal(k1, (2, 4, 16, 16, 16), jnp.float32) * 4.0
    f1 = jax.jit(lambda v: pallas_softmax(v, 1))
    y1 = jax.block_until_ready(f1(x1))
    ref1 = jax.nn.softmax(x1, axis=1)
    assert y1.shape == x1.shape, y1.shape
    assert bool(jnp.allclose(y1, ref1, atol=1e-3, rtol=1e-3)), \
        float(jnp.max(jnp.abs(y1 - ref1)))
    assert bool(jnp.allclose(jnp.sum(y1, axis=1), 1.0, atol=2e-3))

    # Case 2: last-axis softmax with a non-multiple-of-128 width (row-tiled path).
    x2 = jax.random.normal(k2, (2, 8, 16, 200), jnp.float32) * 4.0
    sm = softmax(dim=-1)
    f2 = jax.jit(lambda v: sm(v))
    y2 = jax.block_until_ready(f2(x2))
    ref2 = jax.nn.softmax(x2, axis=-1)
    assert y2.shape == x2.shape, y2.shape
    assert bool(jnp.allclose(y2, ref2, atol=1e-3, rtol=1e-3)), \
        float(jnp.max(jnp.abs(y2 - ref2)))

    # Case 3: softmax over a middle axis with small, unaligned dims.
    x3 = jax.random.normal(k3, (2, 3, 5, 7), jnp.float32) * 4.0
    f3 = jax.jit(lambda v: pallas_softmax(v, 2))
    y3 = jax.block_until_ready(f3(x3))
    ref3 = jax.nn.softmax(x3, axis=2)
    assert y3.shape == x3.shape, y3.shape
    assert bool(jnp.allclose(y3, ref3, atol=1e-3, rtol=1e-3)), \
        float(jnp.max(jnp.abs(y3 - ref3)))

    print("KERNEL_OK")
</pallas_src>

<mosaic_0001>
module attributes {stable_mosaic.version = 11 : i64} {
  func.func @_softmax_inner_kernel(%arg0: i32, %arg1: i32, %arg2: memref<2x4x4096xf32, #tpu.memory_space<vmem>>, %arg3: memref<2x4x4096xf32, #tpu.memory_space<vmem>>) attributes {dimension_semantics = [#tpu.dimension_semantics<parallel>, #tpu.dimension_semantics<parallel>], iteration_bounds = array<i64: 1, 1>, scalar_prefetch = 0 : i64, scratch_operands = 0 : i64, tpu.core_type = #tpu.core_type<tc>, window_params = [{transform_indices = @transform_0, window_bounds = array<i64: 2, 4, 4096>}, {transform_indices = @transform_1, window_bounds = array<i64: 2, 4, 4096>}]} {
    %c0 = arith.constant 0 : index
    %c0_0 = arith.constant 0 : index
    %c0_1 = arith.constant 0 : index
    %0 = vector.load %arg2[%c0, %c0_0, %c0_1] : memref<2x4x4096xf32, #tpu.memory_space<vmem>>, vector<2x4x4096xf32>
    %cst = arith.constant dense<0xFF800000> : vector<2x4096xf32>
    %1 = vector.multi_reduction <maximumf>, %0, %cst [1] : vector<2x4x4096xf32> to vector<2x4096xf32>
    %2 = vector.shape_cast %1 : vector<2x4096xf32> to vector<2x1x4096xf32>
    %3 = vector.broadcast %2 : vector<2x1x4096xf32> to vector<2x4x4096xf32>
    %4 = arith.subf %0, %3 : vector<2x4x4096xf32>
    %5 = math.exp %4 : vector<2x4x4096xf32>
    %cst_2 = arith.constant dense<0.000000e+00> : vector<2x4096xf32>
    %6 = vector.multi_reduction <add>, %5, %cst_2 [1] : vector<2x4x4096xf32> to vector<2x4096xf32>
    %7 = vector.shape_cast %6 : vector<2x4096xf32> to vector<2x1x4096xf32>
    %8 = tpu.reciprocal %7 {approx = true} : vector<2x1x4096xf32> -> vector<2x1x4096xf32>
    %9 = arith.mulf %7, %8 : vector<2x1x4096xf32>
    %cst_3 = arith.constant 2.000000e+00 : f32
    %10 = vector.broadcast %cst_3 : f32 to vector<2x1x4096xf32>
    %11 = arith.subf %10, %9 : vector<2x1x4096xf32>
    %12 = arith.mulf %8, %11 : vector<2x1x4096xf32>
    %13 = vector.broadcast %12 : vector<2x1x4096xf32> to vector<2x4x4096xf32>
    %14 = arith.mulf %5, %13 : vector<2x4x4096xf32>
    %c0_4 = arith.constant 0 : index
    %c0_5 = arith.constant 0 : index
    %c0_6 = arith.constant 0 : index
    %15 = vector.load %arg3[%c0_4, %c0_5, %c0_6] : memref<2x4x4096xf32, #tpu.memory_space<vmem>>, vector<2x4x4096xf32>
    tpu.vector_store %arg3[%c0_4, %c0_5, %c0_6], %14 {strides = array<i32>} : memref<2x4x4096xf32, #tpu.memory_space<vmem>>, vector<2x4x4096xf32>,
    return
  }
  func.func @transform_0(%arg0: i32, %arg1: i32) -> (i32, i32, i32) {
    %c0_i32 = arith.constant 0 : i32
    %c0_i32_0 = arith.constant 0 : i32
    return %arg0, %c0_i32, %arg1 : i32, i32, i32
  }
  func.func @transform_1(%arg0: i32, %arg1: i32) -> (i32, i32, i32) {
    %c0_i32 = arith.constant 0 : i32
    %c0_i32_0 = arith.constant 0 : i32
    return %arg0, %c0_i32, %arg1 : i32, i32, i32
  }
}

</mosaic_0001>

<bundles_post_ra>
// kernel: _lambda_.1
= control target key start
LH: loop header
LB: loop body
LE: loop exit
PB: predicated region body
PF: predicated region fallthrough
CT: control target
= control target key end

     0   :  { %vm136_vm0 = vcmask 1043456   ;;  %s3014_s0 = inlined_call_operand.vmem [shape: f32[2,4,4096], index: 0, kind: input, shape index: {}]   ;;  %s3015_s1 = inlined_call_operand.vmem [shape: f32[2,4,4096], index: 1, kind: output, shape index: {}]  }
   0x1   :  { %v2042_v0 = vld [vmem:[%s3014_s0] sm:$0xff]  ;;  %v2047_v1 = vld [vmem:[%s3014_s0 + $0x8] sm:$0xff]  ;;  %v2052_v2 = vld [vmem:[%s3014_s0 + $0x10] sm:$0xff] }
   0x2   :  { %v72_v3 = vcombine.high %v2042_v0, %v2042_v0  ;;  %v137_v4 = vsel %vm136_vm0, %v2042_v0, -inf  ;;  %v73_v5 = vcombine.high %v2047_v1, %v2047_v1  ;;  %v151_v6 = vsel %vm136_vm0, %v2047_v1, -inf  ;;  %v2065_v7 = vld [vmem:[%s3014_s0 + $0x18] sm:$0xff]  ;;  %v2082_v48 = vld [vmem:[%s3014_s0 + $0x20] sm:$0xff]  ;;  %v2087_v57 = vld [vmem:[%s3014_s0 + $0x28] sm:$0xff] }
   0x3   :  { %v138_v8 = vrot.slane %v137_v4, 4  ;;  %v152_v9 = vrot.slane %v151_v6, 4  ;;  %v74_v10 = vcombine.high %v2052_v2, %v2052_v2  ;;  %v165_v11 = vsel %vm136_vm0, %v2052_v2, -inf }
   0x4   :  { %v144_v12 = vsel %vm136_vm0, %v72_v3, -inf  ;;  %v158_v13 = vsel %vm136_vm0, %v73_v5, -inf  ;;  %v166_v14 = vrot.slane %v165_v11, 4  ;;  %v75_v15 = vcombine.high %v2065_v7, %v2065_v7 }
   0x5   :  { %v139_v16 = vmax.f32 %v137_v4, %v138_v8  ;;  %v145_v17 = vrot.slane %v144_v12, 4  ;;  %v153_v18 = vmax.f32 %v151_v6, %v152_v9  ;;  %v159_v19 = vrot.slane %v158_v13, 4 }
   0x6   :  { %v167_v20 = vmax.f32 %v165_v11, %v166_v14  ;;  %v172_v21 = vsel %vm136_vm0, %v74_v10, -inf  ;;  %v179_v22 = vsel %vm136_vm0, %v2065_v7, -inf  ;;  %v186_v23 = vsel %vm136_vm0, %v75_v15, -inf }
   0x7   :  { %v140_v24 = vrot.slane %v139_v16, 2  ;;  %v146_v25 = vmax.f32 %v144_v12, %v145_v17  ;;  %v154_v26 = vrot.slane %v153_v18, 2  ;;  %v160_v27 = vmax.f32 %v158_v13, %v159_v19 }
   0x8   :  { %v168_v28 = vrot.slane %v167_v20, 2  ;;  %v173_v29 = vrot.slane %v172_v21, 4  ;;  %v180_v30 = vrot.slane %v179_v22, 4  ;;  %v187_v31 = vrot.slane %v186_v23, 4 }
   0x9   :  { %v141_v32 = vmax.f32 %v139_v16, %v140_v24  ;;  %v147_v33 = vrot.slane %v146_v25, 2  ;;  %v155_v34 = vmax.f32 %v153_v18, %v154_v26  ;;  %v161_v35 = vrot.slane %v160_v27, 2 }
   0xa   :  { %v169_v36 = vmax.f32 %v167_v20, %v168_v28  ;;  %v174_v37 = vmax.f32 %v172_v21, %v173_v29  ;;  %v181_v38 = vmax.f32 %v179_v22, %v180_v30  ;;  %v188_v39 = vmax.f32 %v186_v23, %v187_v31  ;;  %v2103_v22 = vld [vmem:[%s3014_s0 + $0x30] sm:$0xff] }
   0xb   :  { %v142_v40 = vrot.slane %v141_v32, 1  ;;  %v148_v41 = vmax.f32 %v146_v25, %v147_v33  ;;  %v156_v42 = vrot.slane %v155_v34, 1  ;;  %v162_v43 = vmax.f32 %v160_v27, %v161_v35 }
   0xc   :  { %v170_v44 = vrot.slane %v169_v36, 1  ;;  %v175_v45 = vrot.slane %v174_v37, 2  ;;  %v182_v46 = vrot.slane %v181_v38, 2  ;;  %v189_v47 = vrot.slane %v188_v39, 2 }
   0xd   :  { %v143_v49 = vmax.f32 %v141_v32, %v142_v40  ;;  %v149_v50 = vrot.slane %v148_v41, 1  ;;  %v157_v51 = vmax.f32 %v155_v34, %v156_v42  ;;  %v163_v52 = vrot.slane %v162_v43, 1 }
   0xe   :  { %v171_v53 = vmax.f32 %v169_v36, %v170_v44  ;;  %v176_v54 = vmax.f32 %v174_v37, %v175_v45  ;;  %v183_v55 = vmax.f32 %v181_v38, %v182_v46  ;;  %v190_v56 = vmax.f32 %v188_v39, %v189_v47  ;;  %v2121_v44 = vld [vmem:[%s3014_s0 + $0x40] sm:$0xff] }
   0xf   :  { %v150_v58 = vmax.f32 %v148_v41, %v149_v50  ;;  %v164_v59 = vmax.f32 %v162_v43, %v163_v52  ;;  %v76_v60 = vcombine.high %v2082_v48, %v2082_v48  ;;  %v193_v61 = vsel %vm136_vm0, %v2082_v48, -inf }
  0x10   :  { %v177_v62 = vrot.slane %v176_v54, 1  ;;  %v184_v63 = vrot.slane %v183_v55, 1  ;;  %v191_v3 = vrot.slane %v190_v56, 1  ;;  %v194_v4 = vrot.slane %v193_v61, 4 }
  0x11   :  { %v649_v5 = vcombine.low %v143_v49, %v150_v58  ;;  %v650_v6 = vcombine.low %v157_v51, %v164_v59  ;;  %v200_v8 = vsel %vm136_vm0, %v76_v60, -inf  ;;  %v77_v9 = vcombine.high %v2087_v57, %v2087_v57 }
  0x12   :  { %v178_v10 = vmax.f32 %v176_v54, %v177_v62  ;;  %v185_v11 = vmax.f32 %v183_v55, %v184_v63  ;;  %v192_v12 = vmax.f32 %v190_v56, %v191_v3  ;;  %v195_v13 = vmax.f32 %v193_v61, %v194_v4 }
  0x13   :  { %v713_v14 = vsub.f32 %v2042_v0, %v649_v5  ;;  %v714_v15 = vsub.f32 %v2047_v1, %v650_v6  ;;  %v201_v16 = vrot.slane %v200_v8, 4  ;;  %v207_v17 = vsel %vm136_vm0, %v2087_v57, -inf }
  0x14   :  { %v651_v18 = vcombine.low %v171_v53, %v178_v10  ;;  %v652_v19 = vcombine.low %v185_v11, %v192_v12  ;;  %v196_v20 = vrot.slane %v195_v13, 2  ;;  %v208_v21 = vrot.slane %v207_v17, 4 }
  0x15   :  { %v745_v23 = vmul.f32 1.442695, %v713_v14  ;;  %v747_v24 = vmul.f32 1.442695, %v714_v15  ;;  %v202_v25 = vmax.f32 %v200_v8, %v201_v16  ;;  %v214_v0 = vsel %vm136_vm0, %v77_v9, -inf }
  0x16   :  { %v715_v1 = vsub.f32 %v2052_v2, %v651_v18  ;;  %v716_v26 = vsub.f32 %v2065_v7, %v652_v19  ;;  %v197_v27 = vmax.f32 %v195_v13, %v196_v20  ;;  %v209_v28 = vmax.f32 %v207_v17, %v208_v21  ;;  %v2115_v7 = vld [vmem:[%s3014_s0 + $0x38] sm:$0xff] }
  0x17   :  { %1837 = vpow2.f32 %v745_v23  ;;  %v203_v29 = vrot.slane %v202_v25, 2  ;;  %v215_v30 = vrot.slane %v214_v0, 4  ;;  %v78_v31 = vcombine.high %v2103_v22, %v2103_v22 }
  0x18   :  { %1839 = vpow2.f32 %v747_v24  ;;  %v749_v32 = vmul.f32 1.442695, %v715_v1  ;;  %v751_v33 = vmul.f32 1.442695, %v716_v26  ;;  %v198_v34 = vrot.slane %v197_v27, 1 }
  0x19   :  { %v204_v35 = vmax.f32 %v202_v25, %v203_v29  ;;  %v210_v36 = vrot.slane %v209_v28, 2  ;;  %v216_v37 = vmax.f32 %v214_v0, %v215_v30  ;;  %v221_v2 = vsel %vm136_vm0, %v2103_v22, -inf }
  0x1a   :  { %1841 = vpow2.f32 %v749_v32  ;;  %v199_v38 = vmax.f32 %v197_v27, %v198_v34  ;;  %v222_v39 = vrot.slane %v221_v2, 4  ;;  %v228_v40 = vsel %vm136_vm0, %v78_v31, -inf }
  0x1b   :  { %1843 = vpow2.f32 %v751_v33  ;;  %v205_v41 = vrot.slane %v204_v35, 1  ;;  %v211_v42 = vmax.f32 %v209_v28, %v210_v36  ;;  %v217_v43 = vrot.slane %v216_v37, 2 }
  0x1c   :  { %v223_v45 = vmax.f32 %v221_v2, %v222_v39  ;;  %v229_v46 = vrot.slane %v228_v40, 4  ;;  %v79_v47 = vcombine.high %v2115_v7, %v2115_v7  ;;  %v235_v49 = vsel %vm136_vm0, %v2115_v7, -inf }
  0x1d   :  { %v206_v50 = vmax.f32 %v204_v35, %v205_v41  ;;  %v212_v51 = vrot.slane %v211_v42, 1  ;;  %v218_v52 = vmax.f32 %v216_v37, %v217_v43  ;;  %v236_v53 = vrot.slane %v235_v49, 4 }
  0x1e   :  { %v224_v54 = vrot.slane %v223_v45, 2  ;;  %v230_v55 = vmax.f32 %v228_v40, %v229_v46  ;;  %v242_v56 = vsel %vm136_vm0, %v79_v47, -inf  ;;  %v80_v58 = vcombine.high %v2121_v44, %v2121_v44 }
  0x1f   :  { %v653_v59 = vcombine.low %v199_v38, %v206_v50  ;;  %v213_v60 = vmax.f32 %v211_v42, %v212_v51  ;;  %v219_v61 = vrot.slane %v218_v52, 1  ;;  %v237_v62 = vmax.f32 %v235_v49, %v236_v53 }
  0x20   :  { %v225_v63 = vmax.f32 %v223_v45, %v224_v54  ;;  %v231_v3 = vrot.slane %v230_v55, 2  ;;  %v243_v4 = vrot.slane %v242_v56, 4  ;;  %v249_v5 = vsel %vm136_vm0, %v2121_v44, -inf }
  0x21   :  { %v717_v6 = vsub.f32 %v2082_v48, %v653_v59  ;;  %v220_v8 = vmax.f32 %v218_v52, %v219_v61  ;;  %v238_v9 = vrot.slane %v237_v62, 2  ;;  %v250_v10 = vrot.slane %v249_v5, 4 }
  0x22   :  { %v226_v11 = vrot.slane %v225_v63, 1  ;;  %v232_v12 = vmax.f32 %v230_v55, %v231_v3  ;;  %v2133_v13 = vmax.f32 %v242_v56, %v243_v4  ;;  %v2136_v14 = vsel %vm136_vm0, %v80_v58, -inf }
  0x23   :  { %v753_v15 = vmul.f32 1.442695, %v717_v6  ;;  %v654_v16 = vcombine.low %v213_v60, %v220_v8  ;;  %v2138_v17 = vmax.f32 %v237_v62, %v238_v9  ;;  %v2140_v18 = vmax.f32 %v249_v5, %v250_v10 }
  0x24   :  { %v2142_v19 = vpop.eup %1837  ;;  %v2144_v20 = vmax.f32 %v225_v63, %v226_v11  ;;  %v233_v48 = vrot.slane %v232_v12, 1  ;;  %v245_v21 = vrot.slane %v2133_v13, 2  ;;  %v257_v23 = vrot.slane %v2136_v14, 4 }
  0x25   :  { %v2148_v24 = vpop.eup %1839  ;;  %v841_v25 = vcombine.high %v2142_v19, %v2142_v19  ;;  %v905_v0 = vsel %vm136_vm0, %v2142_v19, 0.0  ;;  %1845 = vpow2.f32 %v753_v15  ;;  %v718_v1 = vsub.f32 %v2087_v57, %v654_v16 }
  0x26   :  { %v906_v26 = vrot.slane %v905_v0, 4  ;;  %v842_v27 = vcombine.high %v2148_v24, %v2148_v24  ;;  %v919_v28 = vsel %vm136_vm0, %v2148_v24, 0.0  ;;  %v2159_v29 = vmax.f32 %v232_v12, %v233_v48 }
  0x27   :  { %v2161_v30 = vpop.eup %1841  ;;  %v912_v31 = vsel %vm136_vm0, %v841_v25, 0.0  ;;  %v920_v32 = vrot.slane %v919_v28, 4  ;;  %v2164_v33 = vmul.f32 1.442695, %v718_v1  ;;  %v240_v34 = vrot.slane %v2138_v17, 1 }
  0x28   :  { %v2167_v35 = vpop.eup %1843  ;;  %v907_v57 = vadd.f32 %v906_v26, %v905_v0  ;;  %v913_v36 = vrot.slane %v912_v31, 4  ;;  %v926_v37 = vsel %vm136_vm0, %v842_v27, 0.0  ;;  %v843_v2 = vcombine.high %v2161_v30, %v2161_v30 }
  0x29   :  { %v921_v38 = vadd.f32 %v920_v32, %v919_v28  ;;  %v927_v39 = vrot.slane %v926_v37, 4  ;;  %v933_v40 = vsel %vm136_vm0, %v2161_v30, 0.0  ;;  %v844_v41 = vcombine.high %v2167_v35, %v2167_v35 }
  0x2a   :  { %v908_v42 = vrot.slane %v907_v57, 2  ;;  %v914_v43 = vadd.f32 %v913_v36, %v912_v31  ;;  %v934_v45 = vrot.slane %v933_v40, 4  ;;  %v940_v46 = vsel %vm136_vm0, %v843_v2, 0.0 }
  0x2b   :  { %v922_v47 = vrot.slane %v921_v38, 2  ;;  %v928_v49 = vadd.f32 %v927_v39, %v926_v37  ;;  %v941_v50 = vrot.slane %v940_v46, 4  ;;  %v947_v51 = vsel %vm136_vm0, %v2167_v35, 0.0 }
  0x2c   :  { %v909_v52 = vadd.f32 %v908_v42, %v907_v57  ;;  %v915_v53 = vrot.slane %v914_v43, 2  ;;  %v935_v54 = vadd.f32 %v934_v45, %v933_v40  ;;  %v948_v55 = vrot.slane %v947_v51, 4 }
  0x2d   :  { %v923_v56 = vadd.f32 %v922_v47, %v921_v38  ;;  %v929_v58 = vrot.slane %v928_v49, 2  ;;  %v942_v59 = vadd.f32 %v941_v50, %v940_v46  ;;  %v954_v60 = vsel %vm136_vm0, %v844_v41, 0.0 }
  0x2e   :  { %v910_v61 = vrot.slane %v909_v52, 1  ;;  %v916_v62 = vadd.f32 %v915_v53, %v914_v43  ;;  %v936_v63 = vrot.slane %v935_v54, 2  ;;  %v949_v3 = vadd.f32 %v948_v55, %v947_v51  ;;  %v2219_v51 = vld [vmem:[%s3014_s0 + $0x48] sm:$0xff] }
  0x2f   :  { %v924_v4 = vrot.slane %v923_v56, 1  ;;  %v930_v5 = vadd.f32 %v929_v58, %v928_v49  ;;  %v943_v6 = vrot.slane %v942_v59, 2  ;;  %v955_v8 = vrot.slane %v954_v60, 4 }
  0x30   :  { %v2180_v9 = vadd.f32 %v910_v61, %v909_v52  ;;  %v917_v10 = vrot.slane %v916_v62, 1  ;;  %v937_v11 = vadd.f32 %v936_v63, %v935_v54  ;;  %v950_v12 = vrot.slane %v949_v3, 2 }
  0x31   :  { %v2182_v15 = vadd.f32 %v924_v4, %v923_v56  ;;  %v931_v16 = vrot.slane %v930_v5, 1  ;;  %v944_v48 = vadd.f32 %v943_v6, %v942_v59  ;;  %v956_v25 = vadd.f32 %v955_v8, %v954_v60  ;;  %v2236_v59 = vld [vmem:[%s3014_s0 + $0x50] sm:$0xff] }
  0x32   :  { %v2184_v0 = vpop.eup %1845  ;;  %v2186_v1 = vadd.f32 %v917_v10, %v916_v62  ;;  %1847 = vrcp.f32 %v2180_v9  ;;  %v938_v26 = vrot.slane %v937_v11, 1  ;;  %v951_v27 = vadd.f32 %v950_v12, %v949_v3 }
  0x33   :  { %v2189_v28 = vadd.f32 %v931_v16, %v930_v5  ;;  %1849 = vrcp.f32 %v2182_v15  ;;  %v945_v31 = vrot.slane %v944_v48, 1  ;;  %v957_v32 = vrot.slane %v956_v25, 2 }
  0x34   :  { %1851 = vrcp.f32 %v2186_v1  ;;  %v2193_v57 = vadd.f32 %v938_v26, %v937_v11  ;;  %v952_v36 = vrot.slane %v951_v27, 1  ;;  %v845_v37 = vcombine.high %v2184_v0, %v2184_v0 }
  0x35   :  { %1853 = vrcp.f32 %v2189_v28  ;;  %v2198_v2 = vadd.f32 %v945_v31, %v944_v48  ;;  %v958_v38 = vadd.f32 %v957_v32, %v956_v25  ;;  %v961_v39 = vsel %vm136_vm0, %v2184_v0, 0.0 }
  0x36   :  { %1855 = vrcp.f32 %v2193_v57  ;;  %v2203_v40 = vadd.f32 %v952_v36, %v951_v27  ;;  %v962_v41 = vrot.slane %v961_v39, 4  ;;  %v968_v42 = vsel %vm136_vm0, %v845_v37, 0.0 }
  0x37   :  { %1857 = vrcp.f32 %v2198_v2  ;;  %v959_v43 = vrot.slane %v958_v38, 1  ;;  %v969_v45 = vrot.slane %v968_v42, 4  ;;  %v655_v46 = vcombine.low %v2144_v20, %v2159_v29 }
  0x38   :  { %1859 = vrcp.f32 %v2203_v40  ;;  %v963_v47 = vadd.f32 %v962_v41, %v961_v39  ;;  %v241_v49 = vmax.f32 %v2138_v17, %v240_v34  ;;  %v246_v50 = vmax.f32 %v2133_v13, %v245_v21 }
  0x39   :  { %v2221_v52 = vadd.f32 %v959_v43, %v958_v38  ;;  %v970_v53 = vadd.f32 %v969_v45, %v968_v42  ;;  %1861 = vpow2.f32 %v2164_v33  ;;  %v719_v20 = vsub.f32 %v2103_v22, %v655_v46 }
  0x3a   :  { %v964_v29 = vrot.slane %v963_v47, 2  ;;  %v247_v54 = vrot.slane %v246_v50, 1  ;;  %v252_v17 = vrot.slane %v2140_v18, 2  ;;  %v258_v13 = vmax.f32 %v2136_v14, %v257_v23 }
  0x3b   :  { %1863 = vrcp.f32 %v2221_v52  ;;  %v971_v21 = vrot.slane %v970_v53, 2  ;;  %v757_v34 = vmul.f32 1.442695, %v719_v20  ;;  %v81_v55 = vcombine.high %v2219_v51, %v2219_v51 }
  0x3c   :  { %v965_v56 = vadd.f32 %v964_v29, %v963_v47  ;;  %v248_v58 = vmax.f32 %v246_v50, %v247_v54  ;;  %v253_v33 = vmax.f32 %v2140_v18, %v252_v17  ;;  %v259_v22 = vrot.slane %v258_v13, 2 }
  0x3d   :  { %v972_v60 = vadd.f32 %v971_v21, %v970_v53  ;;  %1865 = vpow2.f32 %v757_v34  ;;  %v263_v14 = vsel %vm136_vm0, %v2219_v51, -inf  ;;  %v2241_v23 = vsel %vm136_vm0, %v81_v55, -inf }
  0x3e   :  { %v966_v61 = vrot.slane %v965_v56, 1  ;;  %v656_v62 = vcombine.low %v241_v49, %v248_v58  ;;  %v254_v63 = vrot.slane %v253_v33, 1  ;;  %v260_v3 = vmax.f32 %v258_v13, %v259_v22 }
  0x3f   :  { %v1848_v4 = vpop.eup %1847  ;;  %v973_v18 = vrot.slane %v972_v60, 1  ;;  %v264_v5 = vrot.slane %v263_v14, 4  ;;  %v271_v6 = vrot.slane %v2241_v23, 4  ;;  %v82_v8 = vcombine.high %v2236_v59, %v2236_v59 }
  0x40   :  { %v1850_v10 = vpop.eup %1849  ;;  %v1417_v11 = vmul.f32 %v1848_v4, %v2180_v9  ;;  %v2247_v12 = vadd.f32 %v966_v61, %v965_v56  ;;  %v720_v16 = vsub.f32 %v2115_v7, %v656_v62  ;;  %v255_v48 = vmax.f32 %v253_v33, %v254_v63 }
  0x41   :  { %v1852_v25 = vpop.eup %1851  ;;  %v1419_v26 = vmul.f32 %v1850_v10, %v2182_v15  ;;  %v2251_v27 = vadd.f32 %v973_v18, %v972_v60  ;;  %v261_v31 = vrot.slane %v260_v3, 1  ;;  %v2253_v32 = vmax.f32 %v263_v14, %v264_v5 }
  0x42   :  { %v1854_v36 = vpop.eup %1853  ;;  %v1418_v37 = vmul.f32 %v1852_v25, %v2186_v1  ;;  %v1481_v38 = vsub.f32 2.0, %v1417_v11  ;;  %1867 = vrcp.f32 %v2247_v12  ;;  %v759_v9 = vmul.f32 1.442695, %v720_v16 }
  0x43   :  { %v1856_v39 = vpop.eup %1855  ;;  %v1420_v41 = vmul.f32 %v1854_v36, %v2189_v28  ;;  %v1483_v7 = vsub.f32 2.0, %v1419_v26  ;;  %1869 = vrcp.f32 %v2251_v27  ;;  %v262_v42 = vmax.f32 %v260_v3, %v261_v31 }
  0x44   :  { %v1858_v15 = vpop.eup %1857  ;;  %v1482_v43 = vsub.f32 2.0, %v1418_v37  ;;  %v1545_v45 = vmul.f32 %v1848_v4, %v1481_v38  ;;  %v1421_v46 = vmul.f32 %v1856_v39, %v2193_v57  ;;  %1871 = vpow2.f32 %v759_v9 }
  0x45   :  { %v1860_v47 = vpop.eup %1859  ;;  %v1484_v49 = vsub.f32 2.0, %v1420_v41  ;;  %v1547_v1 = vmul.f32 %v1850_v10, %v1483_v7  ;;  %v1422_v50 = vmul.f32 %v1858_v15, %v2198_v2  ;;  %v657_v53 = vcombine.low %v255_v48, %v262_v42 }
  0x46   :  { %v2261_v20 = vpop.eup %1861  ;;  %v1546_v29 = vmul.f32 %v1852_v25, %v1482_v43  ;;  %v1485_v28 = vsub.f32 2.0, %v1421_v46  ;;  %v1423_v54 = vmul.f32 %v1860_v47, %v2203_v40  ;;  %v266_v17 = vrot.slane %v2253_v32, 2 }
  0x47   :  { %v1548_v13 = vmul.f32 %v1854_v36, %v1484_v49  ;;  %v1486_v21 = vsub.f32 2.0, %v1422_v50  ;;  %v846_v57 = vcombine.high %v2261_v20, %v2261_v20  ;;  %v975_v34 = vsel %vm136_vm0, %v2261_v20, 0.0 }
  0x48   :  { %v1864_v55 = vpop.eup %1863  ;;  %v1673_v56 = vcombine.low %v1545_v45, %v1546_v29  ;;  %v1549_v2 = vmul.f32 %v1856_v39, %v1485_v28  ;;  %v1487_v58 = vsub.f32 2.0, %v1423_v54  ;;  %v976_v33 = vrot.slane %v975_v34, 4 }
  0x49   :  { %v1674_v22 = vcombine.low %v1547_v1, %v1548_v13  ;;  %v1550_v60 = vmul.f32 %v1858_v15, %v1486_v21  ;;  %v1424_v14 = vmul.f32 %v1864_v55, %v2221_v52  ;;  %v982_v40 = vsel %vm136_vm0, %v846_v57, 0.0 }
  0x4a   :  { %v2271_v61 = vpop.eup %1865  ;;  %v1737_v62 = vmul.f32 %v2142_v19, %v1673_v56  ;;  %v1551_v63 = vmul.f32 %v1860_v47, %v1487_v58  ;;  %v977_v3 = vadd.f32 %v976_v33, %v975_v34  ;;  %v983_v4 = vrot.slane %v982_v40, 4 }
  0x4b   :  { %v1738_v18 = vmul.f32 %v2148_v24, %v1674_v22  ;;  %v1675_v5 = vcombine.low %v1549_v2, %v1550_v60  ;;  %v1488_v10 = vsub.f32 2.0, %v1424_v14  ;;  %v847_v11 = vcombine.high %v2271_v61, %v2271_v61 }
  0x4c   :  { %1769 = vst [vmem:[%s3015_s1] sm:$0xff] %v1737_v62  ;;  %v978_v52 = vrot.slane %v977_v3, 2  ;;  %v984_v16 = vadd.f32 %v983_v4, %v982_v40  ;;  %v989_v48 = vsel %vm136_vm0, %v2271_v61, 0.0  ;;  %v721_v19 = vsub.f32 %v2121_v44, %v657_v53 }
  0x4d   :  { %1770 = vst [vmem:[%s3015_s1 + $0x8] sm:$0xff] %v1738_v18  ;;  %v1739_v24 = vmul.f32 %v2161_v30, %v1675_v5  ;;  %v1552_v25 = vmul.f32 %v1864_v55, %v1488_v10  ;;  %v990_v26 = vrot.slane %v989_v48, 4  ;;  %v996_v31 = vsel %vm136_vm0, %v847_v11, 0.0  ;;  %v2330_v10 = vld [vmem:[%s3014_s0 + $0x60] sm:$0xff] }
  0x4e   :  { %v979_v36 = vadd.f32 %v978_v52, %v977_v3  ;;  %v985_v37 = vrot.slane %v984_v16, 2  ;;  %v997_v38 = vrot.slane %v996_v31, 4  ;;  %v761_v9 = vmul.f32 1.442695, %v721_v19  ;;  %v2323_v3 = vld [vmem:[%s3014_s0 + $0x58] sm:$0xff] }
  0x4f   :  { %v1868_v39 = vpop.eup %1867  ;;  %1771 = vst [vmem:[%s3015_s1 + $0x10] sm:$0xff] %v1739_v24  ;;  %v1676_v44 = vcombine.low %v1551_v63, %v1552_v25  ;;  %v991_v41 = vadd.f32 %v990_v26, %v989_v48  ;;  %v267_v7 = vmax.f32 %v2253_v32, %v266_v17  ;;  %v272_v30 = vmax.f32 %v2241_v23, %v271_v6 }
  0x50   :  { %v1870_v42 = vpop.eup %1869  ;;  %v1425_v15 = vmul.f32 %v1868_v39, %v2247_v12  ;;  %v980_v43 = vrot.slane %v979_v36, 1  ;;  %v986_v45 = vadd.f32 %v985_v37, %v984_v16  ;;  %v998_v46 = vadd.f32 %v997_v38, %v996_v31 }
  0x51   :  { %v2296_v47 = vpop.eup %1871  ;;  %v1740_v49 = vmul.f32 %v2167_v35, %v1676_v44  ;;  %v1426_v1 = vmul.f32 %v1870_v42, %v2251_v27  ;;  %v992_v50 = vrot.slane %v991_v41, 2  ;;  %1873 = vpow2.f32 %v761_v9 }
  0x52   :  { %v1489_v53 = vsub.f32 2.0, %v1425_v15  ;;  %v2300_v32 = vadd.f32 %v980_v43, %v979_v36  ;;  %v987_v29 = vrot.slane %v986_v45, 1  ;;  %v999_v28 = vrot.slane %v998_v46, 2 }
  0x53   :  { %1772 = vst [vmem:[%s3015_s1 + $0x18] sm:$0xff] %v1740_v49  ;;  %v1490_v23 = vsub.f32 2.0, %v1426_v1  ;;  %v993_v6 = vadd.f32 %v992_v50, %v991_v41  ;;  %v848_v12 = vcombine.high %v2296_v47, %v2296_v47  ;;  %v1003_v35 = vsel %vm136_vm0, %v2296_v47, 0.0 }
  0x54   :  { %v1553_v27 = vmul.f32 %v1868_v39, %v1489_v53  ;;  %v2309_v54 = vadd.f32 %v987_v29, %v986_v45  ;;  %1875 = vrcp.f32 %v2300_v32  ;;  %v1000_v17 = vadd.f32 %v999_v28, %v998_v46 }
  0x55   :  { %v1554_v13 = vmul.f32 %v1870_v42, %v1490_v23  ;;  %v994_v21 = vrot.slane %v993_v6, 1  ;;  %v1004_v57 = vrot.slane %v1003_v35, 4  ;;  %v1010_v34 = vsel %vm136_vm0, %v848_v12, 0.0 }
  0x56   :  { %1877 = vrcp.f32 %v2309_v54  ;;  %v1001_v55 = vrot.slane %v1000_v17, 1  ;;  %v1011_v56 = vrot.slane %v1010_v34, 4  ;;  %v268_v2 = vrot.slane %v267_v7, 1 }
  0x57   :  { %v1677_v58 = vcombine.low %v1553_v27, %v1554_v13  ;;  %v2314_v33 = vadd.f32 %v994_v21, %v993_v6  ;;  %v1005_v22 = vadd.f32 %v1004_v57, %v1003_v35  ;;  %v273_v60 = vrot.slane %v272_v30, 2 }
  0x58   :  { %v2316_v14 = vadd.f32 %v1001_v55, %v1000_v17  ;;  %v1012_v40 = vadd.f32 %v1011_v56, %v1010_v34  ;;  %v269_v62 = vmax.f32 %v267_v7, %v268_v2  ;;  %v277_v63 = vsel %vm136_vm0, %v2236_v59, -inf }
  0x59   :  { %v1741_v4 = vmul.f32 %v2184_v0, %v1677_v58  ;;  %1879 = vrcp.f32 %v2314_v33  ;;  %v1006_v18 = vrot.slane %v1005_v22, 2  ;;  %v274_v5 = vmax.f32 %v272_v30, %v273_v60 }
  0x5a   :  { %1881 = vrcp.f32 %v2316_v14  ;;  %v1013_v11 = vrot.slane %v1012_v40, 2  ;;  %v278_v52 = vrot.slane %v277_v63, 4  ;;  %v284_v16 = vsel %vm136_vm0, %v82_v8, -inf }
  0x5b   :  { %1773 = vst [vmem:[%s3015_s1 + $0x20] sm:$0xff] %v1741_v4  ;;  %v1007_v0 = vadd.f32 %v1006_v18, %v1005_v22  ;;  %v275_v48 = vrot.slane %v274_v5, 1  ;;  %v285_v19 = vrot.slane %v284_v16, 4  ;;  %v83_v24 = vcombine.high %v2323_v3, %v2323_v3 }
  0x5c   :  { %v1014_v25 = vadd.f32 %v1013_v11, %v1012_v40  ;;  %v279_v26 = vmax.f32 %v277_v63, %v278_v52  ;;  %v291_v31 = vsel %vm136_vm0, %v2323_v3, -inf  ;;  %v84_v36 = vcombine.high %v2330_v10, %v2330_v10 }
  0x5d   :  { %v1008_v37 = vrot.slane %v1007_v0, 1  ;;  %v276_v8 = vmax.f32 %v274_v5, %v275_v48  ;;  %v286_v38 = vmax.f32 %v284_v16, %v285_v19  ;;  %v292_v9 = vrot.slane %v291_v31, 4 }
  0x5e   :  { %v2346_v39 = vpop.eup %1873  ;;  %v1015_v44 = vrot.slane %v1014_v25, 1  ;;  %v280_v41 = vrot.slane %v279_v26, 2  ;;  %v298_v7 = vsel %vm136_vm0, %v83_v24, -inf  ;;  %v2351_v30 = vsel %vm136_vm0, %v2330_v10, -inf }
  0x5f   :  { %v2353_v42 = vadd.f32 %v1008_v37, %v1007_v0  ;;  %v849_v15 = vcombine.high %v2346_v39, %v2346_v39  ;;  %v1017_v43 = vsel %vm136_vm0, %v2346_v39, 0.0  ;;  %v658_v45 = vcombine.low %v269_v62, %v276_v8 }
  0x60   :  { %v2359_v46 = vadd.f32 %v1015_v44, %v1014_v25  ;;  %v1018_v49 = vrot.slane %v1017_v43, 4  ;;  %v281_v1 = vmax.f32 %v279_v26, %v280_v41  ;;  %v287_v50 = vrot.slane %v286_v38, 2 }
  0x61   :  { %v1876_v53 = vpop.eup %1875  ;;  %1883 = vrcp.f32 %v2353_v42  ;;  %v1024_v29 = vsel %vm136_vm0, %v849_v15, 0.0  ;;  %v722_v28 = vsub.f32 %v2219_v51, %v658_v45  ;;  %v293_v23 = vmax.f32 %v291_v31, %v292_v9 }
  0x62   :  { %v1427_v6 = vmul.f32 %v1876_v53, %v2300_v32  ;;  %1885 = vrcp.f32 %v2359_v46  ;;  %v1019_v12 = vadd.f32 %v1018_v49, %v1017_v43  ;;  %v1025_v35 = vrot.slane %v1024_v29, 4 }
  0x63   :  { %v1878_v27 = vpop.eup %1877  ;;  %v763_v17 = vmul.f32 1.442695, %v722_v28  ;;  %v282_v13 = vrot.slane %v281_v1, 1  ;;  %v288_v21 = vmax.f32 %v286_v38, %v287_v50  ;;  %v294_v57 = vrot.slane %v293_v23, 2 }
  0x64   :  { %v1428_v34 = vmul.f32 %v1878_v27, %v2309_v54  ;;  %v1491_v55 = vsub.f32 2.0, %v1427_v6  ;;  %v1020_v56 = vrot.slane %v1019_v12, 2  ;;  %v1026_v2 = vadd.f32 %v1025_v35, %v1024_v29 }
  0x65   :  { %1887 = vpow2.f32 %v763_v17  ;;  %v283_v58 = vmax.f32 %v281_v1, %v282_v13  ;;  %v289_v51 = vrot.slane %v288_v21, 1  ;;  %v295_v22 = vmax.f32 %v293_v23, %v294_v57 }
  0x66   :  { %v1880_v60 = vpop.eup %1879  ;;  %v1492_v32 = vsub.f32 2.0, %v1428_v34  ;;  %v1555_v40 = vmul.f32 %v1876_v53, %v1491_v55  ;;  %v1021_v62 = vadd.f32 %v1020_v56, %v1019_v12  ;;  %v1027_v63 = vrot.slane %v1026_v2, 2 }
  0x67   :  { %v1882_v4 = vpop.eup %1881  ;;  %v1429_v18 = vmul.f32 %v1880_v60, %v2314_v33  ;;  %v290_v5 = vmax.f32 %v288_v21, %v289_v51  ;;  %v296_v11 = vrot.slane %v295_v22, 1  ;;  %v299_v52 = vrot.slane %v298_v7, 4 }
  0x68   :  { %v1556_v16 = vmul.f32 %v1878_v27, %v1492_v32  ;;  %v1430_v54 = vmul.f32 %v1882_v4, %v2316_v14  ;;  %v1022_v0 = vrot.slane %v1021_v62, 1  ;;  %v1028_v48 = vadd.f32 %v1027_v63, %v1026_v2  ;;  %v2376_v14 = vld [vmem:[%s3014_s0 + $0x68] sm:$0xff] }
  0x69   :  { %v1493_v19 = vsub.f32 2.0, %v1429_v18  ;;  %v659_v24 = vcombine.low %v283_v58, %v290_v5  ;;  %v297_v25 = vmax.f32 %v295_v22, %v296_v11  ;;  %v300_v26 = vmax.f32 %v298_v7, %v299_v52 }
  0x6a   :  { %v1678_v31 = vcombine.low %v1555_v40, %v1556_v16  ;;  %v1494_v37 = vsub.f32 2.0, %v1430_v54  ;;  %v2369_v8 = vadd.f32 %v1022_v0, %v1021_v62  ;;  %v1029_v38 = vrot.slane %v1028_v48, 1 }
  0x6b   :  { %v1557_v9 = vmul.f32 %v1880_v60, %v1493_v19  ;;  %v723_v33 = vsub.f32 %v2236_v59, %v659_v24  ;;  %v301_v44 = vrot.slane %v300_v26, 2  ;;  %v306_v41 = vrot.slane %v2351_v30, 4 }
  0x6c   :  { %v1742_v15 = vmul.f32 %v2261_v20, %v1678_v31  ;;  %v1558_v43 = vmul.f32 %v1882_v4, %v1494_v37  ;;  %v2379_v7 = vadd.f32 %v1029_v38, %v1028_v48  ;;  %1889 = vrcp.f32 %v2369_v8 }
  0x6d   :  { %v765_v45 = vmul.f32 1.442695, %v723_v33  ;;  %v302_v49 = vmax.f32 %v300_v26, %v301_v44  ;;  %v307_v1 = vmax.f32 %v2351_v30, %v306_v41  ;;  %v312_v59 = vsel %vm136_vm0, %v84_v36, -inf  ;;  %v2397_v36 = vld [vmem:[%s3014_s0 + $0x70] sm:$0xff] }
  0x6e   :  { %v1884_v50 = vpop.eup %1883  ;;  %1774 = vst [vmem:[%s3015_s1 + $0x28] sm:$0xff] %v1742_v15  ;;  %v1679_v20 = vcombine.low %v1557_v9, %v1558_v43  ;;  %1891 = vrcp.f32 %v2379_v7  ;;  %v313_v53 = vrot.slane %v312_v59, 4  ;;  %v85_v29 = vcombine.high %v2376_v14, %v2376_v14 }
  0x6f   :  { %v1886_v28 = vpop.eup %1885  ;;  %v1431_v30 = vmul.f32 %v1884_v50, %v2353_v42  ;;  %1893 = vpow2.f32 %v765_v45  ;;  %v303_v23 = vrot.slane %v302_v49, 1  ;;  %v308_v6 = vrot.slane %v307_v1, 2 }
  0x70   :  { %v1743_v12 = vmul.f32 %v2271_v61, %v1679_v20  ;;  %v1432_v35 = vmul.f32 %v1886_v28, %v2359_v46  ;;  %v314_v27 = vmax.f32 %v312_v59, %v313_v53  ;;  %v319_v17 = vsel %vm136_vm0, %v2376_v14, -inf }
  0x71   :  { %v1495_v13 = vsub.f32 2.0, %v1431_v30  ;;  %v304_v21 = vmax.f32 %v302_v49, %v303_v23  ;;  %v309_v57 = vmax.f32 %v307_v1, %v308_v6  ;;  %v320_v42 = vrot.slane %v319_v17, 4 }
  0x72   :  { %v2403_v34 = vpop.eup %1887  ;;  %1775 = vst [vmem:[%s3015_s1 + $0x30] sm:$0xff] %v1743_v12  ;;  %v1496_v55 = vsub.f32 2.0, %v1432_v35  ;;  %v315_v56 = vrot.slane %v314_v27, 2  ;;  %v326_v61 = vsel %vm136_vm0, %v85_v29, -inf  ;;  %v86_v46 = vcombine.high %v2397_v36, %v2397_v36 }
  0x73   :  { %v1559_v2 = vmul.f32 %v1884_v50, %v1495_v13  ;;  %v850_v58 = vcombine.high %v2403_v34, %v2403_v34  ;;  %v1031_v51 = vsel %vm136_vm0, %v2403_v34, 0.0  ;;  %v660_v22 = vcombine.low %v297_v25, %v304_v21 }
  0x74   :  { %v1560_v60 = vmul.f32 %v1886_v28, %v1496_v55  ;;  %v1032_v32 = vrot.slane %v1031_v51, 4  ;;  %v310_v40 = vrot.slane %v309_v57, 1  ;;  %v316_v62 = vmax.f32 %v314_v27, %v315_v56 }
  0x75   :  { %v1038_v63 = vsel %vm136_vm0, %v850_v58, 0.0  ;;  %v724_v4 = vsub.f32 %v2323_v3, %v660_v22  ;;  %v321_v18 = vmax.f32 %v319_v17, %v320_v42  ;;  %v327_v5 = vrot.slane %v326_v61, 4 }
  0x76   :  { %v1680_v11 = vcombine.low %v1559_v2, %v1560_v60  ;;  %v1033_v52 = vadd.f32 %v1032_v32, %v1031_v51  ;;  %v1039_v16 = vrot.slane %v1038_v63, 4  ;;  %v311_v54 = vmax.f32 %v309_v57, %v310_v40 }
  0x77   :  { %v767_v0 = vmul.f32 1.442695, %v724_v4  ;;  %v317_v48 = vrot.slane %v316_v62, 1  ;;  %v322_v19 = vrot.slane %v321_v18, 2  ;;  %v328_v24 = vmax.f32 %v326_v61, %v327_v5 }
  0x78   :  { %v1744_v25 = vmul.f32 %v2296_v47, %v1680_v11  ;;  %v1034_v26 = vrot.slane %v1033_v52, 2  ;;  %v1040_v31 = vadd.f32 %v1039_v16, %v1038_v63  ;;  %v333_v37 = vsel %vm136_vm0, %v2397_v36, -inf  ;;  %v2450_v63 = vld [vmem:[%s3014_s0 + $0x80] sm:$0xff] }
  0x79   :  { %v1890_v38 = vpop.eup %1889  ;;  %1895 = vpow2.f32 %v767_v0  ;;  %v318_v3 = vmax.f32 %v316_v62, %v317_v48  ;;  %v323_v9 = vmax.f32 %v321_v18, %v322_v19  ;;  %v329_v33 = vrot.slane %v328_v24, 2 }
  0x7a   :  { %1776 = vst [vmem:[%s3015_s1 + $0x38] sm:$0xff] %v1744_v25  ;;  %v1433_v44 = vmul.f32 %v1890_v38, %v2369_v8  ;;  %v1035_v41 = vadd.f32 %v1034_v26, %v1033_v52  ;;  %v1041_v15 = vrot.slane %v1040_v31, 2  ;;  %v334_v43 = vrot.slane %v333_v37, 4 }
  0x7b   :  { %v1892_v47 = vpop.eup %1891  ;;  %v661_v45 = vcombine.low %v311_v54, %v318_v3  ;;  %v324_v49 = vrot.slane %v323_v9, 1  ;;  %v330_v1 = vmax.f32 %v328_v24, %v329_v33  ;;  %v340_v59 = vsel %vm136_vm0, %v86_v46, -inf }
  0x7c   :  { %v2425_v50 = vpop.eup %1893  ;;  %v1434_v20 = vmul.f32 %v1892_v47, %v2379_v7  ;;  %v1497_v53 = vsub.f32 2.0, %v1433_v44  ;;  %v1036_v29 = vrot.slane %v1035_v41, 1  ;;  %v1042_v28 = vadd.f32 %v1041_v15, %v1040_v31 }
  0x7d   :  { %v851_v30 = vcombine.high %v2425_v50, %v2425_v50  ;;  %v1045_v8 = vsel %vm136_vm0, %v2425_v50, 0.0  ;;  %v725_v23 = vsub.f32 %v2330_v10, %v661_v45  ;;  %v325_v6 = vmax.f32 %v323_v9, %v324_v49  ;;  %v2442_v10 = vld [vmem:[%s3014_s0 + $0x78] sm:$0xff] }
  0x7e   :  { %v1498_v12 = vsub.f32 2.0, %v1434_v20  ;;  %v1561_v35 = vmul.f32 %v1890_v38, %v1497_v53  ;;  %v2433_v27 = vadd.f32 %v1036_v29, %v1035_v41  ;;  %v1043_v17 = vrot.slane %v1042_v28, 1 }
  0x7f   :  { %v1046_v13 = vrot.slane %v1045_v8, 4  ;;  %v1052_v7 = vsel %vm136_vm0, %v851_v30, 0.0  ;;  %v769_v21 = vmul.f32 1.442695, %v725_v23  ;;  %v331_v57 = vrot.slane %v330_v1, 1 }
  0x80   :  { %v1562_v42 = vmul.f32 %v1892_v47, %v1498_v12  ;;  %v2436_v55 = vadd.f32 %v1043_v17, %v1042_v28  ;;  %1897 = vrcp.f32 %v2433_v27  ;;  %v1053_v56 = vrot.slane %v1052_v7, 4 }
  0x81   :  { %v1047_v61 = vadd.f32 %v1046_v13, %v1045_v8  ;;  %1899 = vpow2.f32 %v769_v21  ;;  %v332_v46 = vmax.f32 %v330_v1, %v331_v57  ;;  %v335_v2 = vmax.f32 %v333_v37, %v334_v43 }
  0x82   :  { %v1681_v58 = vcombine.low %v1561_v35, %v1562_v42  ;;  %1901 = vrcp.f32 %v2436_v55  ;;  %v1054_v51 = vadd.f32 %v1053_v56, %v1052_v7  ;;  %v341_v22 = vrot.slane %v340_v59, 4 }
  0x83   :  { %v1048_v60 = vrot.slane %v1047_v61, 2  ;;  %v662_v32 = vcombine.low %v325_v6, %v332_v46  ;;  %v336_v40 = vrot.slane %v335_v2, 2  ;;  %v87_v62 = vcombine.high %v2442_v10, %v2442_v10 }
  0x84   :  { %v1745_v4 = vmul.f32 %v2346_v39, %v1681_v58  ;;  %v1055_v18 = vrot.slane %v1054_v51, 2  ;;  %v342_v5 = vmax.f32 %v340_v59, %v341_v22  ;;  %v347_v11 = vsel %vm136_vm0, %v2442_v10, -inf }
  0x85   :  { %v1049_v52 = vadd.f32 %v1048_v60, %v1047_v61  ;;  %v726_v16 = vsub.f32 %v2376_v14, %v662_v32  ;;  %v337_v54 = vmax.f32 %v335_v2, %v336_v40  ;;  %v348_v0 = vrot.slane %v347_v11, 4 }
  0x86   :  { %v2456_v48 = vpop.eup %1895  ;;  %1777 = vst [vmem:[%s3015_s1 + $0x40] sm:$0xff] %v1745_v4  ;;  %v1056_v19 = vadd.f32 %v1055_v18, %v1054_v51  ;;  %v343_v24 = vrot.slane %v342_v5, 2  ;;  %v354_v39 = vsel %vm136_vm0, %v87_v62, -inf  ;;  %v88_v25 = vcombine.high %v2450_v63, %v2450_v63 }
  0x87   :  { %v1050_v26 = vrot.slane %v1049_v52, 1  ;;  %v852_v31 = vcombine.high %v2456_v48, %v2456_v48  ;;  %v1059_v14 = vsel %vm136_vm0, %v2456_v48, 0.0  ;;  %v771_v37 = vmul.f32 1.442695, %v726_v16 }
  0x88   :  { %v1057_v38 = vrot.slane %v1056_v19, 1  ;;  %v1060_v3 = vrot.slane %v1059_v14, 4  ;;  %v338_v9 = vrot.slane %v337_v54, 1  ;;  %v344_v33 = vmax.f32 %v342_v5, %v343_v24 }
  0x89   :  { %v2468_v44 = vadd.f32 %v1050_v26, %v1049_v52  ;;  %v1066_v41 = vsel %vm136_vm0, %v852_v31, 0.0  ;;  %1903 = vpow2.f32 %v771_v37  ;;  %v349_v15 = vmax.f32 %v347_v11, %v348_v0 }
  0x8a   :  { %v2471_v43 = vadd.f32 %v1057_v38, %v1056_v19  ;;  %v1061_v47 = vadd.f32 %v1060_v3, %v1059_v14  ;;  %v1067_v45 = vrot.slane %v1066_v41, 4  ;;  %v339_v49 = vmax.f32 %v337_v54, %v338_v9 }
  0x8b   :  { %1905 = vrcp.f32 %v2468_v44  ;;  %v345_v1 = vrot.slane %v344_v33, 1  ;;  %v350_v59 = vrot.slane %v349_v15, 2  ;;  %v355_v20 = vrot.slane %v354_v39, 4 }
  0x8c   :  { %1907 = vrcp.f32 %v2471_v43  ;;  %v1062_v53 = vrot.slane %v1061_v47, 2  ;;  %v1068_v29 = vadd.f32 %v1067_v45, %v1066_v41  ;;  %v361_v28 = vsel %vm136_vm0, %v2450_v63, -inf }
  0x8d   :  { %v1898_v30 = vpop.eup %1897  ;;  %v346_v8 = vmax.f32 %v344_v33, %v345_v1  ;;  %v351_v23 = vmax.f32 %v349_v15, %v350_v59  ;;  %v356_v6 = vmax.f32 %v354_v39, %v355_v20  ;;  %v362_v12 = vrot.slane %v361_v28, 4 }
  0x8e   :  { %v2477_v35 = vpop.eup %1899  ;;  %v1435_v17 = vmul.f32 %v1898_v30, %v2433_v27  ;;  %v1063_v13 = vadd.f32 %v1062_v53, %v1061_v47  ;;  %v1069_v7 = vrot.slane %v1068_v29, 2  ;;  %v2481_v21 = vsel %vm136_vm0, %v88_v25, -inf }
  0x8f   :  { %v1902_v57 = vpop.eup %1901  ;;  %v853_v42 = vcombine.high %v2477_v35, %v2477_v35  ;;  %v1073_v56 = vsel %vm136_vm0, %v2477_v35, 0.0  ;;  %v663_v61 = vcombine.low %v339_v49, %v346_v8  ;;  %v352_v46 = vrot.slane %v351_v23, 1 }
  0x90   :  { %v1436_v2 = vmul.f32 %v1902_v57, %v2436_v55  ;;  %v1499_v58 = vsub.f32 2.0, %v1435_v17  ;;  %v1064_v51 = vrot.slane %v1063_v13, 1  ;;  %v1070_v22 = vadd.f32 %v1069_v7, %v1068_v29 }
  0x91   :  { %v1074_v27 = vrot.slane %v1073_v56, 4  ;;  %v1080_v60 = vsel %vm136_vm0, %v853_v42, 0.0  ;;  %v727_v32 = vsub.f32 %v2397_v36, %v663_v61  ;;  %v353_v40 = vmax.f32 %v351_v23, %v352_v46 }
  0x92   :  { %v1500_v62 = vsub.f32 2.0, %v1436_v2  ;;  %v1563_v4 = vmul.f32 %v1898_v30, %v1499_v58  ;;  %v2490_v18 = vadd.f32 %v1064_v51, %v1063_v13  ;;  %v1071_v5 = vrot.slane %v1070_v22, 1  ;;  %v2524_v51 = vld [vmem:[%s3014_s0 + $0x90] sm:$0xff] }
  0x93   :  { %v1075_v11 = vadd.f32 %v1074_v27, %v1073_v56  ;;  %v1081_v52 = vrot.slane %v1080_v60, 4  ;;  %v773_v16 = vmul.f32 1.442695, %v727_v32  ;;  %v357_v54 = vrot.slane %v356_v6, 2 }
  0x94   :  { %v1564_v0 = vmul.f32 %v1902_v57, %v1500_v62  ;;  %v2492_v55 = vadd.f32 %v1071_v5, %v1070_v22  ;;  %1909 = vrcp.f32 %v2490_v18  ;;  %v363_v19 = vmax.f32 %v361_v28, %v362_v12  ;;  %v2515_v57 = vld [vmem:[%s3014_s0 + $0x88] sm:$0xff] }
  0x95   :  { %v1076_v24 = vrot.slane %v1075_v11, 2  ;;  %v1082_v39 = vadd.f32 %v1081_v52, %v1080_v60  ;;  %1911 = vpow2.f32 %v773_v16  ;;  %v358_v36 = vmax.f32 %v356_v6, %v357_v54 }
  0x96   :  { %v2495_v25 = vpop.eup %1903  ;;  %v1682_v26 = vcombine.low %v1563_v4, %v1564_v0  ;;  %1913 = vrcp.f32 %v2492_v55  ;;  %v364_v31 = vrot.slane %v363_v19, 2  ;;  %v369_v14 = vrot.slane %v2481_v21, 4 }
  0x97   :  { %v1077_v37 = vadd.f32 %v1076_v24, %v1075_v11  ;;  %v1083_v38 = vrot.slane %v1082_v39, 2  ;;  %v854_v3 = vcombine.high %v2495_v25, %v2495_v25  ;;  %v1087_v9 = vsel %vm136_vm0, %v2495_v25, 0.0 }
  0x98   :  { %v1906_v33 = vpop.eup %1905  ;;  %v1746_v41 = vmul.f32 %v2403_v34, %v1682_v26  ;;  %v1088_v15 = vrot.slane %v1087_v9, 4  ;;  %v359_v47 = vrot.slane %v358_v36, 1  ;;  %v365_v45 = vmax.f32 %v363_v19, %v364_v31 }
  0x99   :  { %v1908_v49 = vpop.eup %1907  ;;  %v1437_v1 = vmul.f32 %v1906_v33, %v2468_v44  ;;  %v1078_v59 = vrot.slane %v1077_v37, 1  ;;  %v1084_v20 = vadd.f32 %v1083_v38, %v1082_v39  ;;  %v1094_v53 = vsel %vm136_vm0, %v854_v3, 0.0 }
  0x9a   :  { %1778 = vst [vmem:[%s3015_s1 + $0x48] sm:$0xff] %v1746_v41  ;;  %v1438_v29 = vmul.f32 %v1908_v49, %v2471_v43  ;;  %v1089_v28 = vadd.f32 %v1088_v15, %v1087_v9  ;;  %v1095_v30 = vrot.slane %v1094_v53, 4  ;;  %v360_v8 = vmax.f32 %v358_v36, %v359_v47 }
  0x9b   :  { %v1501_v34 = vsub.f32 2.0, %v1437_v1  ;;  %v2510_v23 = vadd.f32 %v1078_v59, %v1077_v37  ;;  %v1085_v6 = vrot.slane %v1084_v20, 1  ;;  %v366_v12 = vrot.slane %v365_v45, 1 }
  0x9c   :  { %v1502_v17 = vsub.f32 2.0, %v1438_v29  ;;  %v1090_v44 = vrot.slane %v1089_v28, 2  ;;  %v1096_v13 = vadd.f32 %v1095_v30, %v1094_v53  ;;  %v664_v7 = vcombine.low %v353_v40, %v360_v8 }
  0x9d   :  { %v1565_v42 = vmul.f32 %v1906_v33, %v1501_v34  ;;  %v2517_v56 = vadd.f32 %v1085_v6, %v1084_v20  ;;  %1915 = vrcp.f32 %v2510_v23  ;;  %v367_v43 = vmax.f32 %v365_v45, %v366_v12 }
  0x9e   :  { %v1566_v61 = vmul.f32 %v1908_v49, %v1502_v17  ;;  %v1091_v46 = vadd.f32 %v1090_v44, %v1089_v28  ;;  %v1097_v2 = vrot.slane %v1096_v13, 2  ;;  %v728_v58 = vsub.f32 %v2442_v10, %v664_v7 }
  0x9f   :  { %1917 = vrcp.f32 %v2517_v56  ;;  %v370_v22 = vmax.f32 %v2481_v21, %v369_v14  ;;  %v89_v27 = vcombine.high %v2515_v57, %v2515_v57  ;;  %v375_v60 = vsel %vm136_vm0, %v2515_v57, -inf }
  0xa0   :  { %v1683_v32 = vcombine.low %v1565_v42, %v1566_v61  ;;  %v1092_v40 = vrot.slane %v1091_v46, 1  ;;  %v1098_v62 = vadd.f32 %v1097_v2, %v1096_v13  ;;  %v775_v4 = vmul.f32 1.442695, %v728_v58 }
  0xa1   :  { %v1910_v10 = vpop.eup %1909  ;;  %v371_v5 = vrot.slane %v370_v22, 2  ;;  %v376_v11 = vrot.slane %v375_v60, 4  ;;  %v382_v52 = vsel %vm136_vm0, %v89_v27, -inf  ;;  %v90_v16 = vcombine.high %v2524_v51, %v2524_v51 }
  0xa2   :  { %v2535_v54 = vpop.eup %1911  ;;  %v1747_v21 = vmul.f32 %v2425_v50, %v1683_v32  ;;  %v1439_v0 = vmul.f32 %v1910_v10, %v2490_v18  ;;  %v2539_v19 = vadd.f32 %v1092_v40, %v1091_v46  ;;  %v1099_v24 = vrot.slane %v1098_v62, 1 }
  0xa3   :  { %v1914_v39 = vpop.eup %1913  ;;  %v855_v36 = vcombine.high %v2535_v54, %v2535_v54  ;;  %v1101_v26 = vsel %vm136_vm0, %v2535_v54, 0.0  ;;  %1919 = vpow2.f32 %v775_v4  ;;  %v372_v31 = vmax.f32 %v370_v22, %v371_v5 }
  0xa4   :  { %1779 = vst [vmem:[%s3015_s1 + $0x50] sm:$0xff] %v1747_v21  ;;  %v1440_v50 = vmul.f32 %v1914_v39, %v2492_v55  ;;  %v1503_v14 = vsub.f32 2.0, %v1439_v0  ;;  %v2549_v18 = vadd.f32 %v1099_v24, %v1098_v62  ;;  %1921 = vrcp.f32 %v2539_v19 }
  0xa5   :  { %v1102_v37 = vrot.slane %v1101_v26, 4  ;;  %v1108_v38 = vsel %vm136_vm0, %v855_v36, 0.0  ;;  %v373_v3 = vrot.slane %v372_v31, 1  ;;  %v377_v9 = vmax.f32 %v375_v60, %v376_v11 }
  0xa6   :  { %v1504_v33 = vsub.f32 2.0, %v1440_v50  ;;  %v1567_v41 = vmul.f32 %v1910_v10, %v1503_v14  ;;  %1923 = vrcp.f32 %v2549_v18  ;;  %v1109_v15 = vrot.slane %v1108_v38, 4 }
  0xa7   :  { %v1103_v47 = vadd.f32 %v1102_v37, %v1101_v26  ;;  %v374_v45 = vmax.f32 %v372_v31, %v373_v3  ;;  %v378_v49 = vrot.slane %v377_v9, 2  ;;  %v383_v1 = vrot.slane %v382_v52, 4 }
  0xa8   :  { %v1568_v55 = vmul.f32 %v1914_v39, %v1504_v33  ;;  %v1110_v59 = vadd.f32 %v1109_v15, %v1108_v38  ;;  %v389_v20 = vsel %vm136_vm0, %v2524_v51, -inf  ;;  %v396_v53 = vsel %vm136_vm0, %v90_v16, -inf }
  0xa9   :  { %v1104_v29 = vrot.slane %v1103_v47, 2  ;;  %v665_v28 = vcombine.low %v367_v43, %v374_v45  ;;  %v379_v30 = vmax.f32 %v377_v9, %v378_v49  ;;  %v384_v8 = vmax.f32 %v382_v52, %v383_v1  ;;  %v2582_v45 = vld [vmem:[%s3014_s0 + $0x98] sm:$0xff] }
  0xaa   :  { %v1916_v34 = vpop.eup %1915  ;;  %v1684_v6 = vcombine.low %v1567_v41, %v1568_v55  ;;  %v1111_v12 = vrot.slane %v1110_v59, 2  ;;  %v390_v17 = vrot.slane %v389_v20, 4  ;;  %v397_v44 = vrot.slane %v396_v53, 4 }
  0xab   :  { %v1441_v13 = vmul.f32 %v1916_v34, %v2510_v23  ;;  %v1105_v7 = vadd.f32 %v1104_v29, %v1103_v47  ;;  %v729_v42 = vsub.f32 %v2450_v63, %v665_v28  ;;  %v380_v61 = vrot.slane %v379_v30, 1 }
  0xac   :  { %v1918_v46 = vpop.eup %1917  ;;  %v1748_v2 = vmul.f32 %v2456_v48, %v1684_v6  ;;  %v1112_v58 = vadd.f32 %v1111_v12, %v1110_v59  ;;  %v385_v22 = vrot.slane %v384_v8, 2  ;;  %v391_v27 = vmax.f32 %v389_v20, %v390_v17 }
  0xad   :  { %v1442_v43 = vmul.f32 %v1918_v46, %v2517_v56  ;;  %v1505_v60 = vsub.f32 2.0, %v1441_v13  ;;  %v1106_v32 = vrot.slane %v1105_v7, 1  ;;  %v777_v40 = vmul.f32 1.442695, %v729_v42 }
  0xae   :  { %1780 = vst [vmem:[%s3015_s1 + $0x58] sm:$0xff] %v1748_v2  ;;  %v1113_v23 = vrot.slane %v1112_v58, 1  ;;  %v381_v62 = vmax.f32 %v379_v30, %v380_v61  ;;  %v386_v4 = vmax.f32 %v384_v8, %v385_v22  ;;  %v392_v63 = vrot.slane %v391_v27, 2 }
  0xaf   :  { %v1506_v10 = vsub.f32 2.0, %v1442_v43  ;;  %v1569_v5 = vmul.f32 %v1916_v34, %v1505_v60  ;;  %v2564_v11 = vadd.f32 %v1106_v32, %v1105_v7  ;;  %1925 = vpow2.f32 %v777_v40 }
  0xb0   :  { %v2566_v48 = vpop.eup %1919  ;;  %v2568_v52 = vadd.f32 %v1113_v23, %v1112_v58  ;;  %v387_v56 = vrot.slane %v386_v4, 1  ;;  %v393_v16 = vmax.f32 %v391_v27, %v392_v63  ;;  %v398_v21 = vmax.f32 %v396_v53, %v397_v44 }
  0xb1   :  { %v1922_v0 = vpop.eup %1921  ;;  %v1570_v24 = vmul.f32 %v1918_v46, %v1506_v10  ;;  %1927 = vrcp.f32 %v2564_v11  ;;  %v856_v39 = vcombine.high %v2566_v48, %v2566_v48  ;;  %v1115_v36 = vsel %vm136_vm0, %v2566_v48, 0.0 }
  0xb2   :  { %v1443_v26 = vmul.f32 %v1922_v0, %v2539_v19  ;;  %1929 = vrcp.f32 %v2568_v52  ;;  %v1116_v31 = vrot.slane %v1115_v36, 4  ;;  %v388_v50 = vmax.f32 %v386_v4, %v387_v56 }
  0xb3   :  { %v1924_v14 = vpop.eup %1923  ;;  %v1685_v37 = vcombine.low %v1569_v5, %v1570_v24  ;;  %v1122_v38 = vsel %vm136_vm0, %v856_v39, 0.0  ;;  %v394_v3 = vrot.slane %v393_v16, 1  ;;  %v399_v9 = vrot.slane %v398_v21, 2 }
  0xb4   :  { %v1444_v33 = vmul.f32 %v1924_v14, %v2549_v18  ;;  %v1507_v41 = vsub.f32 2.0, %v1443_v26  ;;  %v1117_v15 = vadd.f32 %v1116_v31, %v1115_v36  ;;  %v1123_v47 = vrot.slane %v1122_v38, 4  ;;  %v2588_v18 = vld [vmem:[%s3014_s0 + $0xa0] sm:$0xff] }
  0xb5   :  { %v1749_v19 = vmul.f32 %v2477_v35, %v1685_v37  ;;  %v666_v49 = vcombine.low %v381_v62, %v388_v50  ;;  %v395_v1 = vmax.f32 %v393_v16, %v394_v3  ;;  %v400_v55 = vmax.f32 %v398_v21, %v399_v9 }
  0xb6   :  { %v1508_v59 = vsub.f32 2.0, %v1444_v33  ;;  %v1571_v20 = vmul.f32 %v1922_v0, %v1507_v41  ;;  %v1118_v53 = vrot.slane %v1117_v15, 2  ;;  %v1124_v29 = vadd.f32 %v1123_v47, %v1122_v38 }
  0xb7   :  { %1781 = vst [vmem:[%s3015_s1 + $0x60] sm:$0xff] %v1749_v19  ;;  %v730_v28 = vsub.f32 %v2515_v57, %v666_v49  ;;  %v401_v30 = vrot.slane %v400_v55, 1  ;;  %v91_v35 = vcombine.high %v2582_v45, %v2582_v45  ;;  %v403_v8 = vsel %vm136_vm0, %v2582_v45, -inf }
  0xb8   :  { %v1572_v34 = vmul.f32 %v1924_v14, %v1508_v59  ;;  %v1119_v6 = vadd.f32 %v1118_v53, %v1117_v15  ;;  %v1125_v12 = vrot.slane %v1124_v29, 2  ;;  %v404_v17 = vrot.slane %v403_v8, 4 }
  0xb9   :  { %v779_v44 = vmul.f32 1.442695, %v730_v28  ;;  %v402_v13 = vmax.f32 %v400_v55, %v401_v30  ;;  %v410_v7 = vsel %vm136_vm0, %v91_v35, -inf  ;;  %v92_v42 = vcombine.high %v2588_v18, %v2588_v18 }
  0xba   :  { %v1686_v61 = vcombine.low %v1571_v20, %v1572_v34  ;;  %v1120_v57 = vrot.slane %v1119_v6, 1  ;;  %v1126_v46 = vadd.f32 %v1125_v12, %v1124_v29  ;;  %v405_v2 = vmax.f32 %v403_v8, %v404_v17 }
  0xbb   :  { %1931 = vpow2.f32 %v779_v44  ;;  %v667_v58 = vcombine.low %v395_v1, %v402_v13  ;;  %v411_v22 = vrot.slane %v410_v7, 4  ;;  %v417_v27 = vsel %vm136_vm0, %v2588_v18, -inf }
  0xbc   :  { %v2603_v43 = vpop.eup %1925  ;;  %v1750_v60 = vmul.f32 %v2495_v25, %v1686_v61  ;;  %v2606_v32 = vadd.f32 %v1120_v57, %v1119_v6  ;;  %v1127_v40 = vrot.slane %v1126_v46, 1  ;;  %v406_v23 = vrot.slane %v405_v2, 2 }
  0xbd   :  { %v857_v62 = vcombine.high %v2603_v43, %v2603_v43  ;;  %v1129_v4 = vsel %vm136_vm0, %v2603_v43, 0.0  ;;  %v731_v63 = vsub.f32 %v2524_v51, %v667_v58  ;;  %v412_v10 = vmax.f32 %v410_v7, %v411_v22 }
  0xbe   :  { %v1928_v5 = vpop.eup %1927  ;;  %1782 = vst [vmem:[%s3015_s1 + $0x68] sm:$0xff] %v1750_v60  ;;  %v2616_v56 = vadd.f32 %v1127_v40, %v1126_v46  ;;  %1933 = vrcp.f32 %v2606_v32  ;;  %v1130_v25 = vrot.slane %v1129_v4, 4  ;;  %v407_v16 = vmax.f32 %v405_v2, %v406_v23 }
  0xbf   :  { %v1930_v21 = vpop.eup %1929  ;;  %v1445_v0 = vmul.f32 %v1928_v5, %v2564_v11  ;;  %v1136_v24 = vsel %vm136_vm0, %v857_v62, 0.0  ;;  %v781_v39 = vmul.f32 1.442695, %v731_v63  ;;  %v413_v36 = vrot.slane %v412_v10, 2  ;;  %v2626_v11 = vld [vmem:[%s3014_s0 + $0xa8] sm:$0xff] }
  0xc0   :  { %v1446_v51 = vmul.f32 %v1930_v21, %v2568_v52  ;;  %1935 = vrcp.f32 %v2616_v56  ;;  %v1131_v26 = vadd.f32 %v1130_v25, %v1129_v4  ;;  %v1137_v31 = vrot.slane %v1136_v24, 4 }
  0xc1   :  { %v1509_v50 = vsub.f32 2.0, %v1445_v0  ;;  %1937 = vpow2.f32 %v781_v39  ;;  %v408_v14 = vrot.slane %v407_v16, 1  ;;  %v414_v37 = vmax.f32 %v412_v10, %v413_v36 }
  0xc2   :  { %v1510_v38 = vsub.f32 2.0, %v1446_v51  ;;  %v1132_v3 = vrot.slane %v1131_v26, 2  ;;  %v1138_v9 = vadd.f32 %v1137_v31, %v1136_v24  ;;  %v418_v33 = vrot.slane %v417_v27, 4 }
  0xc3   :  { %v1573_v41 = vmul.f32 %v1928_v5, %v1509_v50  ;;  %v409_v15 = vmax.f32 %v407_v16, %v408_v14  ;;  %v415_v52 = vrot.slane %v414_v37, 1  ;;  %v424_v47 = vsel %vm136_vm0, %v92_v42, -inf }
  0xc4   :  { %v1574_v19 = vmul.f32 %v1930_v21, %v1510_v38  ;;  %v1133_v49 = vadd.f32 %v1132_v3, %v1131_v26  ;;  %v1139_v1 = vrot.slane %v1138_v9, 2  ;;  %v419_v55 = vmax.f32 %v417_v27, %v418_v33 }
  0xc5   :  { %v416_v59 = vmax.f32 %v414_v37, %v415_v52  ;;  %v425_v20 = vrot.slane %v424_v47, 4  ;;  %v93_v53 = vcombine.high %v2626_v11, %v2626_v11  ;;  %v431_v29 = vsel %vm136_vm0, %v2626_v11, -inf }
  0xc6   :  { %v1687_v28 = vcombine.low %v1573_v41, %v1574_v19  ;;  %v1134_v30 = vrot.slane %v1133_v49, 1  ;;  %v1140_v35 = vadd.f32 %v1139_v1, %v1138_v9  ;;  %v420_v8 = vrot.slane %v419_v55, 2 }
  0xc7   :  { %v668_v34 = vcombine.low %v409_v15, %v416_v59  ;;  %v426_v6 = vmax.f32 %v424_v47, %v425_v20  ;;  %v432_v12 = vrot.slane %v431_v29, 4  ;;  %v438_v17 = vsel %vm136_vm0, %v93_v53, -inf }
  0xc8   :  { %v2634_v44 = vpop.eup %1931  ;;  %v1751_v13 = vmul.f32 %v2535_v54, %v1687_v28  ;;  %v2637_v7 = vadd.f32 %v1134_v30, %v1133_v49  ;;  %v1141_v42 = vrot.slane %v1140_v35, 1  ;;  %v421_v61 = vmax.f32 %v419_v55, %v420_v8  ;;  %v2664_v49 = vld [vmem:[%s3014_s0 + $0xb0] sm:$0xff] }
  0xc9   :  { %v858_v57 = vcombine.high %v2634_v44, %v2634_v44  ;;  %v1143_v46 = vsel %vm136_vm0, %v2634_v44, 0.0  ;;  %v732_v2 = vsub.f32 %v2582_v45, %v668_v34  ;;  %v427_v58 = vrot.slane %v426_v6, 2 }
  0xca   :  { %1783 = vst [vmem:[%s3015_s1 + $0x70] sm:$0xff] %v1751_v13  ;;  %v2647_v22 = vadd.f32 %v1141_v42, %v1140_v35  ;;  %1939 = vrcp.f32 %v2637_v7  ;;  %v1144_v54 = vrot.slane %v1143_v46, 4  ;;  %v422_v27 = vrot.slane %v421_v61, 1  ;;  %v2678_v42 = vld [vmem:[%s3014_s0 + $0xb8] sm:$0xff] }
  0xcb   :  { %v1934_v60 = vpop.eup %1933  ;;  %v1150_v40 = vsel %vm136_vm0, %v858_v57, 0.0  ;;  %v783_v23 = vmul.f32 1.442695, %v732_v2  ;;  %v428_v62 = vmax.f32 %v426_v6, %v427_v58  ;;  %v433_v4 = vmax.f32 %v431_v29, %v432_v12 }
  0xcc   :  { %v1447_v63 = vmul.f32 %v1934_v60, %v2606_v32  ;;  %1941 = vrcp.f32 %v2647_v22  ;;  %v1145_v45 = vadd.f32 %v1144_v54, %v1143_v46  ;;  %v1151_v10 = vrot.slane %v1150_v40, 4 }
  0xcd   :  { %v1936_v5 = vpop.eup %1935  ;;  %1943 = vpow2.f32 %v783_v23  ;;  %v423_v25 = vmax.f32 %v421_v61, %v422_v27  ;;  %v429_v16 = vrot.slane %v428_v62, 1  ;;  %v434_v21 = vrot.slane %v433_v4, 2 }
  0xce   :  { %v2653_v0 = vpop.eup %1937  ;;  %v1448_v24 = vmul.f32 %v1936_v5, %v2616_v56  ;;  %v1511_v39 = vsub.f32 2.0, %v1447_v63  ;;  %v1146_v36 = vrot.slane %v1145_v45, 2  ;;  %v1152_v51 = vadd.f32 %v1151_v10, %v1150_v40 }
  0xcf   :  { %v859_v26 = vcombine.high %v2653_v0, %v2653_v0  ;;  %v1157_v32 = vsel %vm136_vm0, %v2653_v0, 0.0  ;;  %v430_v31 = vmax.f32 %v428_v62, %v429_v16  ;;  %v435_v50 = vmax.f32 %v433_v4, %v434_v21 }
  0xd0   :  { %v1512_v14 = vsub.f32 2.0, %v1448_v24  ;;  %v1575_v37 = vmul.f32 %v1934_v60, %v1511_v39  ;;  %v1147_v38 = vadd.f32 %v1146_v36, %v1145_v45  ;;  %v1153_v3 = vrot.slane %v1152_v51, 2 }
  0xd1   :  { %v1158_v9 = vrot.slane %v1157_v32, 4  ;;  %v1164_v33 = vsel %vm136_vm0, %v859_v26, 0.0  ;;  %v669_v41 = vcombine.low %v423_v25, %v430_v31  ;;  %v436_v56 = vrot.slane %v435_v50, 1 }
  0xd2   :  { %v1576_v15 = vmul.f32 %v1936_v5, %v1512_v14  ;;  %v1148_v52 = vrot.slane %v1147_v38, 1  ;;  %v1154_v47 = vadd.f32 %v1153_v3, %v1152_v51  ;;  %v1165_v19 = vrot.slane %v1164_v33, 4 }
  0xd3   :  { %v1159_v1 = vadd.f32 %v1158_v9, %v1157_v32  ;;  %v733_v55 = vsub.f32 %v2588_v18, %v669_v41  ;;  %v437_v59 = vmax.f32 %v435_v50, %v436_v56  ;;  %v439_v20 = vrot.slane %v438_v17, 4 }
  0xd4   :  { %v1688_v53 = vcombine.low %v1575_v37, %v1576_v15  ;;  %v2667_v29 = vadd.f32 %v1148_v52, %v1147_v38  ;;  %v1155_v28 = vrot.slane %v1154_v47, 1  ;;  %v1166_v30 = vadd.f32 %v1165_v19, %v1164_v33 }
  0xd5   :  { %v1160_v35 = vrot.slane %v1159_v1, 2  ;;  %v785_v8 = vmul.f32 1.442695, %v733_v55  ;;  %v440_v34 = vmax.f32 %v438_v17, %v439_v20  ;;  %v94_v6 = vcombine.high %v2664_v49, %v2664_v49 }
  0xd6   :  { %v1752_v12 = vmul.f32 %v2566_v48, %v1688_v53  ;;  %v2672_v13 = vadd.f32 %v1155_v28, %v1154_v47  ;;  %1945 = vrcp.f32 %v2667_v29  ;;  %v1167_v18 = vrot.slane %v1166_v30, 2 }
  0xd7   :  { %v1940_v61 = vpop.eup %1939  ;;  %v1161_v57 = vadd.f32 %v1160_v35, %v1159_v1  ;;  %1947 = vpow2.f32 %v785_v8  ;;  %v441_v46 = vrot.slane %v440_v34, 2  ;;  %v445_v17 = vsel %vm136_vm0, %v2664_v49, -inf }
  0xd8   :  { %1784 = vst [vmem:[%s3015_s1 + $0x78] sm:$0xff] %v1752_v12  ;;  %v1449_v48 = vmul.f32 %v1940_v61, %v2637_v7  ;;  %1949 = vrcp.f32 %v2672_v13  ;;  %v1168_v2 = vadd.f32 %v1167_v18, %v1166_v30  ;;  %v446_v58 = vrot.slane %v445_v17, 4 }
  0xd9   :  { %v1942_v54 = vpop.eup %1941  ;;  %v1162_v27 = vrot.slane %v1161_v57, 1  ;;  %v442_v60 = vmax.f32 %v440_v34, %v441_v46  ;;  %v452_v40 = vsel %vm136_vm0, %v94_v6, -inf  ;;  %v95_v23 = vcombine.high %v2678_v42, %v2678_v42 }
  0xda   :  { %v2690_v62 = vpop.eup %1943  ;;  %v1450_v4 = vmul.f32 %v1942_v54, %v2647_v22  ;;  %v1513_v63 = vsub.f32 2.0, %v1449_v48  ;;  %v1169_v45 = vrot.slane %v1168_v2, 1  ;;  %v447_v10 = vmax.f32 %v445_v17, %v446_v58 }
  0xdb   :  { %v2693_v7 = vadd.f32 %v1162_v27, %v1161_v57  ;;  %v860_v5 = vcombine.high %v2690_v62, %v2690_v62  ;;  %v1171_v25 = vsel %vm136_vm0, %v2690_v62, 0.0  ;;  %v443_v16 = vrot.slane %v442_v60, 1 }
  0xdc   :  { %v1514_v21 = vsub.f32 2.0, %v1450_v4  ;;  %v1577_v24 = vmul.f32 %v1940_v61, %v1513_v63  ;;  %v2699_v39 = vadd.f32 %v1169_v45, %v1168_v2  ;;  %v1172_v36 = vrot.slane %v1171_v25, 4 }
  0xdd   :  { %1951 = vrcp.f32 %v2693_v7  ;;  %v1178_v22 = vsel %vm136_vm0, %v860_v5, 0.0  ;;  %v444_v51 = vmax.f32 %v442_v60, %v443_v16  ;;  %v448_v26 = vrot.slane %v447_v10, 2 }
  0xde   :  { %v1578_v32 = vmul.f32 %v1942_v54, %v1514_v21  ;;  %1953 = vrcp.f32 %v2699_v39  ;;  %v1173_v31 = vadd.f32 %v1172_v36, %v1171_v25  ;;  %v1179_v50 = vrot.slane %v1178_v22, 4 }
  0xdf   :  { %v670_v14 = vcombine.low %v437_v59, %v444_v51  ;;  %v449_v37 = vmax.f32 %v447_v10, %v448_v26  ;;  %v453_v38 = vrot.slane %v452_v40, 4  ;;  %v459_v3 = vsel %vm136_vm0, %v2678_v42, -inf }
  0xe0   :  { %v1689_v9 = vcombine.low %v1577_v24, %v1578_v32  ;;  %v1174_v33 = vrot.slane %v1173_v31, 2  ;;  %v1180_v41 = vadd.f32 %v1179_v50, %v1178_v22  ;;  %v460_v56 = vrot.slane %v459_v3, 4 }
  0xe1   :  { %v734_v15 = vsub.f32 %v2626_v11, %v670_v14  ;;  %v450_v52 = vrot.slane %v449_v37, 1  ;;  %v454_v47 = vmax.f32 %v452_v40, %v453_v38  ;;  %v466_v19 = vsel %vm136_vm0, %v95_v23, -inf  ;;  %v2726_v40 = vld [vmem:[%s3014_s0 + $0xc0] sm:$0xff] }
  0xe2   :  { %v1753_v1 = vmul.f32 %v2603_v43, %v1689_v9  ;;  %v1175_v55 = vadd.f32 %v1174_v33, %v1173_v31  ;;  %v1181_v20 = vrot.slane %v1180_v41, 2  ;;  %v461_v59 = vmax.f32 %v459_v3, %v460_v56 }
  0xe3   :  { %v1946_v53 = vpop.eup %1945  ;;  %v787_v28 = vmul.f32 1.442695, %v734_v15  ;;  %v451_v30 = vmax.f32 %v449_v37, %v450_v52  ;;  %v455_v35 = vrot.slane %v454_v47, 2  ;;  %v467_v8 = vrot.slane %v466_v19, 4 }
  0xe4   :  { %v2709_v34 = vpop.eup %1947  ;;  %1785 = vst [vmem:[%s3015_s1 + $0x80] sm:$0xff] %v1753_v1  ;;  %v1451_v11 = vmul.f32 %v1946_v53, %v2667_v29  ;;  %v1176_v6 = vrot.slane %v1175_v55, 1  ;;  %v1182_v12 = vadd.f32 %v1181_v20, %v1180_v41  ;;  %v462_v18 = vrot.slane %v461_v59, 2 }
  0xe5   :  { %v1950_v43 = vpop.eup %1949  ;;  %v861_v61 = vcombine.high %v2709_v34, %v2709_v34  ;;  %v1185_v57 = vsel %vm136_vm0, %v2709_v34, 0.0  ;;  %1955 = vpow2.f32 %v787_v28  ;;  %v456_v46 = vmax.f32 %v454_v47, %v455_v35 }
  0xe6   :  { %v1452_v17 = vmul.f32 %v1950_v43, %v2672_v13  ;;  %v1515_v48 = vsub.f32 2.0, %v1451_v11  ;;  %v2720_v2 = vadd.f32 %v1176_v6, %v1175_v55  ;;  %v1183_v58 = vrot.slane %v1182_v12, 1 }
  0xe7   :  { %v1186_v54 = vrot.slane %v1185_v57, 4  ;;  %v1192_v29 = vsel %vm136_vm0, %v861_v61, 0.0  ;;  %v457_v27 = vrot.slane %v456_v46, 1  ;;  %v463_v60 = vmax.f32 %v461_v59, %v462_v18 }
  0xe8   :  { %v1516_v23 = vsub.f32 2.0, %v1452_v17  ;;  %v1579_v4 = vmul.f32 %v1946_v53, %v1515_v48  ;;  %v2728_v63 = vadd.f32 %v1183_v58, %v1182_v12  ;;  %1957 = vrcp.f32 %v2720_v2 }
  0xe9   :  { %v1187_v13 = vadd.f32 %v1186_v54, %v1185_v57  ;;  %v1193_v45 = vrot.slane %v1192_v29, 4  ;;  %v458_v10 = vmax.f32 %v456_v46, %v457_v27  ;;  %v464_v5 = vrot.slane %v463_v60, 1 }
  0xea   :  { %v1952_v25 = vpop.eup %1951  ;;  %v1580_v16 = vmul.f32 %v1950_v43, %v1516_v23  ;;  %1959 = vrcp.f32 %v2728_v63  ;;  %v468_v21 = vmax.f32 %v466_v19, %v467_v8  ;;  %v96_v24 = vcombine.high %v2726_v40, %v2726_v40 }
  0xeb   :  { %v1954_v36 = vpop.eup %1953  ;;  %v1453_v22 = vmul.f32 %v1952_v25, %v2693_v7  ;;  %v1188_v51 = vrot.slane %v1187_v13, 2  ;;  %v1194_v26 = vadd.f32 %v1193_v45, %v1192_v29  ;;  %v671_v32 = vcombine.low %v451_v30, %v458_v10 }
  0xec   :  { %v1690_v31 = vcombine.low %v1579_v4, %v1580_v16  ;;  %v1454_v50 = vmul.f32 %v1954_v36, %v2699_v39  ;;  %v465_v14 = vmax.f32 %v463_v60, %v464_v5  ;;  %v469_v37 = vrot.slane %v468_v21, 2  ;;  %v2743_v39 = vld [vmem:[%s3014_s0 + $0xc8] sm:$0xff] }
  0xed   :  { %v1517_v38 = vsub.f32 2.0, %v1453_v22  ;;  %v1189_v3 = vadd.f32 %v1188_v51, %v1187_v13  ;;  %v1195_v9 = vrot.slane %v1194_v26, 2  ;;  %v735_v33 = vsub.f32 %v2664_v49, %v671_v32 }
  0xee   :  { %v1754_v41 = vmul.f32 %v2634_v44, %v1690_v31  ;;  %v1518_v56 = vsub.f32 2.0, %v1454_v50  ;;  %v470_v15 = vmax.f32 %v468_v21, %v469_v37  ;;  %v473_v7 = vsel %vm136_vm0, %v2726_v40, -inf }
  0xef   :  { %v1581_v52 = vmul.f32 %v1952_v25, %v1517_v38  ;;  %v1190_v47 = vrot.slane %v1189_v3, 1  ;;  %v1196_v19 = vadd.f32 %v1195_v9, %v1194_v26  ;;  %v789_v1 = vmul.f32 1.442695, %v735_v33 }
  0xf0   :  { %1786 = vst [vmem:[%s3015_s1 + $0x88] sm:$0xff] %v1754_v41  ;;  %v1582_v49 = vmul.f32 %v1954_v36, %v1518_v56  ;;  %v471_v44 = vrot.slane %v470_v15, 1  ;;  %v474_v55 = vrot.slane %v473_v7, 4  ;;  %v480_v20 = vsel %vm136_vm0, %v96_v24, -inf }
  0xf1   :  { %v2749_v59 = vadd.f32 %v1190_v47, %v1189_v3  ;;  %v1197_v53 = vrot.slane %v1196_v19, 1  ;;  %1961 = vpow2.f32 %v789_v1  ;;  %v481_v28 = vrot.slane %v480_v20, 4 }
  0xf2   :  { %v2751_v30 = vpop.eup %1955  ;;  %v1691_v35 = vcombine.low %v1581_v52, %v1582_v49  ;;  %v472_v8 = vmax.f32 %v470_v15, %v471_v44  ;;  %v475_v11 = vmax.f32 %v473_v7, %v474_v55  ;;  %v97_v6 = vcombine.high %v2743_v39, %v2743_v39 }
  0xf3   :  { %v2755_v12 = vadd.f32 %v1197_v53, %v1196_v19  ;;  %1963 = vrcp.f32 %v2749_v59  ;;  %v862_v18 = vcombine.high %v2751_v30, %v2751_v30  ;;  %v1199_v43 = vsel %vm136_vm0, %v2751_v30, 0.0 }
  0xf4   :  { %v1755_v61 = vmul.f32 %v2653_v0, %v1691_v35  ;;  %v1200_v57 = vrot.slane %v1199_v43, 4  ;;  %v672_v46 = vcombine.low %v465_v14, %v472_v8  ;;  %v476_v17 = vrot.slane %v475_v11, 2 }
  0xf5   :  { %v1958_v48 = vpop.eup %1957  ;;  %1965 = vrcp.f32 %v2755_v12  ;;  %v1206_v58 = vsel %vm136_vm0, %v862_v18, 0.0  ;;  %v482_v54 = vmax.f32 %v480_v20, %v481_v28  ;;  %v487_v29 = vsel %vm136_vm0, %v2743_v39, -inf }
  0xf6   :  { %1787 = vst [vmem:[%s3015_s1 + $0x90] sm:$0xff] %v1755_v61  ;;  %v1455_v27 = vmul.f32 %v1958_v48, %v2720_v2  ;;  %v1201_v60 = vadd.f32 %v1200_v57, %v1199_v43  ;;  %v1207_v0 = vrot.slane %v1206_v58, 4  ;;  %v736_v23 = vsub.f32 %v2678_v42, %v672_v46  ;;  %v2777_v42 = vld [vmem:[%s3014_s0 + $0xd0] sm:$0xff] }
  0xf7   :  { %v1960_v4 = vpop.eup %1959  ;;  %v477_v13 = vmax.f32 %v475_v11, %v476_v17  ;;  %v483_v45 = vrot.slane %v482_v54, 2  ;;  %v488_v10 = vrot.slane %v487_v29, 4  ;;  %v494_v5 = vsel %vm136_vm0, %v97_v6, -inf }
  0xf8   :  { %v1456_v25 = vmul.f32 %v1960_v4, %v2728_v63  ;;  %v1519_v16 = vsub.f32 2.0, %v1455_v27  ;;  %v1202_v21 = vrot.slane %v1201_v60, 2  ;;  %v1208_v24 = vadd.f32 %v1207_v0, %v1206_v58  ;;  %v2807_v0 = vld [vmem:[%s3014_s0 + $0xd8] sm:$0xff] }
  0xf9   :  { %v791_v36 = vmul.f32 1.442695, %v736_v23  ;;  %v478_v22 = vrot.slane %v477_v13, 1  ;;  %v484_v51 = vmax.f32 %v482_v54, %v483_v45  ;;  %v489_v26 = vmax.f32 %v487_v29, %v488_v10 }
  0xfa   :  { %v1520_v2 = vsub.f32 2.0, %v1456_v25  ;;  %v1583_v32 = vmul.f32 %v1958_v48, %v1519_v16  ;;  %v1203_v31 = vadd.f32 %v1202_v21, %v1201_v60  ;;  %v1209_v50 = vrot.slane %v1208_v24, 2 }
  0xfb   :  { %1967 = vpow2.f32 %v791_v36  ;;  %v479_v14 = vmax.f32 %v477_v13, %v478_v22  ;;  %v485_v37 = vrot.slane %v484_v51, 1  ;;  %v490_v63 = vrot.slane %v489_v26, 2 }
  0xfc   :  { %v1584_v38 = vmul.f32 %v1960_v4, %v1520_v2  ;;  %v1204_v3 = vrot.slane %v1203_v31, 1  ;;  %v1210_v9 = vadd.f32 %v1209_v50, %v1208_v24  ;;  %v495_v33 = vrot.slane %v494_v5, 4 }
  0xfd   :  { %v486_v41 = vmax.f32 %v484_v51, %v485_v37  ;;  %v491_v56 = vmax.f32 %v489_v26, %v490_v63  ;;  %v98_v15 = vcombine.high %v2777_v42, %v2777_v42  ;;  %v501_v7 = vsel %vm136_vm0, %v2777_v42, -inf }
  0xfe   :  { %v2783_v52 = vpop.eup %1961  ;;  %v1692_v47 = vcombine.low %v1583_v32, %v1584_v38  ;;  %v2785_v19 = vadd.f32 %v1204_v3, %v1203_v31  ;;  %v1211_v1 = vrot.slane %v1210_v9, 1  ;;  %v496_v49 = vmax.f32 %v494_v5, %v495_v33 }
  0xff   :  { %v863_v44 = vcombine.high %v2783_v52, %v2783_v52  ;;  %v1213_v55 = vsel %vm136_vm0, %v2783_v52, 0.0  ;;  %v673_v20 = vcombine.low %v479_v14, %v486_v41  ;;  %v492_v53 = vrot.slane %v491_v56, 1 }
 0x100   :  { %v1964_v28 = vpop.eup %1963  ;;  %v1756_v35 = vmul.f32 %v2690_v62, %v1692_v47  ;;  %v2792_v8 = vadd.f32 %v1211_v1, %v1210_v9  ;;  %1969 = vrcp.f32 %v2785_v19  ;;  %v1214_v11 = vrot.slane %v1213_v55, 4 }
 0x101   :  { %v1457_v6 = vmul.f32 %v1964_v28, %v2749_v59  ;;  %v1220_v18 = vsel %vm136_vm0, %v863_v44, 0.0  ;;  %v737_v43 = vsub.f32 %v2726_v40, %v673_v20  ;;  %v493_v61 = vmax.f32 %v491_v56, %v492_v53 }
 0x102   :  { %v1966_v57 = vpop.eup %1965  ;;  %1788 = vst [vmem:[%s3015_s1 + $0x98] sm:$0xff] %v1756_v35  ;;  %1971 = vrcp.f32 %v2792_v8  ;;  %v1215_v62 = vadd.f32 %v1214_v11, %v1213_v55  ;;  %v1221_v46 = vrot.slane %v1220_v18, 4  ;;  %v497_v17 = vrot.slane %v496_v49, 2 }
 0x103   :  { %v1458_v48 = vmul.f32 %v1966_v57, %v2755_v12  ;;  %v1521_v58 = vsub.f32 2.0, %v1457_v6  ;;  %v793_v54 = vmul.f32 1.442695, %v737_v43  ;;  %v502_v59 = vrot.slane %v501_v7, 4 }
 0x104   :  { %v1216_v29 = vrot.slane %v1215_v62, 2  ;;  %v1222_v27 = vadd.f32 %v1221_v46, %v1220_v18  ;;  %v498_v60 = vmax.f32 %v496_v49, %v497_v17  ;;  %v508_v40 = vsel %vm136_vm0, %v98_v15, -inf }
 0x105   :  { %v1522_v23 = vsub.f32 2.0, %v1458_v48  ;;  %v1585_v4 = vmul.f32 %v1964_v28, %v1521_v58  ;;  %1973 = vpow2.f32 %v793_v54  ;;  %v503_v13 = vmax.f32 %v501_v7, %v502_v59 }
 0x106   :  { %v1217_v45 = vadd.f32 %v1216_v29, %v1215_v62  ;;  %v1223_v10 = vrot.slane %v1222_v27, 2  ;;  %v499_v12 = vrot.slane %v498_v60, 1  ;;  %v509_v5 = vrot.slane %v508_v40, 4 }
 0x107   :  { %v1586_v25 = vmul.f32 %v1966_v57, %v1522_v23  ;;  %v504_v16 = vrot.slane %v503_v13, 2  ;;  %v99_v21 = vcombine.high %v2807_v0, %v2807_v0  ;;  %v515_v24 = vsel %vm136_vm0, %v2807_v0, -inf }
 0x108   :  { %v2813_v36 = vpop.eup %1967  ;;  %v1218_v22 = vrot.slane %v1217_v45, 1  ;;  %v1224_v51 = vadd.f32 %v1223_v10, %v1222_v27  ;;  %v500_v26 = vmax.f32 %v498_v60, %v499_v12  ;;  %v510_v2 = vmax.f32 %v508_v40, %v509_v5 }
 0x109   :  { %v1693_v32 = vcombine.low %v1585_v4, %v1586_v25  ;;  %v864_v31 = vcombine.high %v2813_v36, %v2813_v36  ;;  %v1227_v50 = vsel %vm136_vm0, %v2813_v36, 0.0  ;;  %v505_v14 = vmax.f32 %v503_v13, %v504_v16  ;;  %v2847_v16 = vld [vmem:[%s3014_s0 + $0xe0] sm:$0xff] }
 0x10a   :  { %v2819_v37 = vadd.f32 %v1218_v22, %v1217_v45  ;;  %v1225_v63 = vrot.slane %v1224_v51, 1  ;;  %v1228_v38 = vrot.slane %v1227_v50, 4  ;;  %v674_v3 = vcombine.low %v493_v61, %v500_v26 }
 0x10b   :  { %v1757_v9 = vmul.f32 %v2709_v34, %v1693_v32  ;;  %v1234_v33 = vsel %vm136_vm0, %v864_v31, 0.0  ;;  %v506_v41 = vrot.slane %v505_v14, 1  ;;  %v511_v56 = vrot.slane %v510_v2, 2 }
 0x10c   :  { %v2823_v15 = vadd.f32 %v1225_v63, %v1224_v51  ;;  %1975 = vrcp.f32 %v2819_v37  ;;  %v1229_v7 = vadd.f32 %v1228_v38, %v1227_v50  ;;  %v1235_v47 = vrot.slane %v1234_v33, 4 }
 0x10d   :  { %v1970_v1 = vpop.eup %1969  ;;  %1789 = vst [vmem:[%s3015_s1 + $0xa0] sm:$0xff] %v1757_v9  ;;  %v738_v49 = vsub.f32 %v2743_v39, %v674_v3  ;;  %v507_v44 = vmax.f32 %v505_v14, %v506_v41  ;;  %v512_v55 = vmax.f32 %v510_v2, %v511_v56  ;;  %v516_v34 = vrot.slane %v515_v24, 4  ;;  %v2859_v14 = vld [vmem:[%s3014_s0 + $0xe8] sm:$0xff] }
 0x10e   :  { %v1459_v20 = vmul.f32 %v1970_v1, %v2785_v19  ;;  %1977 = vrcp.f32 %v2823_v15  ;;  %v1230_v53 = vrot.slane %v1229_v7, 2  ;;  %v1236_v28 = vadd.f32 %v1235_v47, %v1234_v33 }
 0x10f   :  { %v1972_v35 = vpop.eup %1971  ;;  %v795_v11 = vmul.f32 1.442695, %v738_v49  ;;  %v513_v6 = vrot.slane %v512_v55, 1  ;;  %v517_v18 = vmax.f32 %v515_v24, %v516_v34  ;;  %v522_v43 = vsel %vm136_vm0, %v99_v21, -inf }
 0x110   :  { %v1460_v61 = vmul.f32 %v1972_v35, %v2792_v8  ;;  %v1523_v57 = vsub.f32 2.0, %v1459_v20  ;;  %v1231_v62 = vadd.f32 %v1230_v53, %v1229_v7  ;;  %v1237_v39 = vrot.slane %v1236_v28, 2 }
 0x111   :  { %1979 = vpow2.f32 %v795_v11  ;;  %v514_v46 = vmax.f32 %v512_v55, %v513_v6  ;;  %v518_v17 = vrot.slane %v517_v18, 2  ;;  %v523_v48 = vrot.slane %v522_v43, 4 }
 0x112   :  { %v2834_v19 = vpop.eup %1973  ;;  %v1524_v58 = vsub.f32 2.0, %v1460_v61  ;;  %v1587_v54 = vmul.f32 %v1970_v1, %v1523_v57  ;;  %v1232_v59 = vrot.slane %v1231_v62, 1  ;;  %v1238_v29 = vadd.f32 %v1237_v39, %v1236_v28 }
 0x113   :  { %v865_v27 = vcombine.high %v2834_v19, %v2834_v19  ;;  %v1241_v60 = vsel %vm136_vm0, %v2834_v19, 0.0  ;;  %v675_v8 = vcombine.low %v507_v44, %v514_v46  ;;  %v519_v40 = vmax.f32 %v517_v18, %v518_v17 }
 0x114   :  { %v1588_v23 = vmul.f32 %v1972_v35, %v1524_v58  ;;  %v2840_v4 = vadd.f32 %v1232_v59, %v1231_v62  ;;  %v1239_v13 = vrot.slane %v1238_v29, 1  ;;  %v1242_v45 = vrot.slane %v1241_v60, 4 }
 0x115   :  { %v1248_v10 = vsel %vm136_vm0, %v865_v27, 0.0  ;;  %v739_v12 = vsub.f32 %v2777_v42, %v675_v8  ;;  %v520_v5 = vrot.slane %v519_v40, 1  ;;  %v524_v25 = vmax.f32 %v522_v43, %v523_v48 }
 0x116   :  { %v1694_v21 = vcombine.low %v1587_v54, %v1588_v23  ;;  %v2849_v24 = vadd.f32 %v1239_v13, %v1238_v29  ;;  %1981 = vrcp.f32 %v2840_v4  ;;  %v1243_v22 = vadd.f32 %v1242_v45, %v1241_v60 }
 0x117   :  { %v1249_v51 = vrot.slane %v1248_v10, 4  ;;  %v797_v26 = vmul.f32 1.442695, %v739_v12  ;;  %v521_v2 = vmax.f32 %v519_v40, %v520_v5  ;;  %v525_v32 = vrot.slane %v524_v25, 2 }
 0x118   :  { %v1758_v31 = vmul.f32 %v2751_v30, %v1694_v21  ;;  %1983 = vrcp.f32 %v2849_v24  ;;  %v1244_v42 = vrot.slane %v1243_v22, 2  ;;  %v100_v50 = vcombine.high %v2847_v16, %v2847_v16 }
 0x119   :  { %v1976_v63 = vpop.eup %1975  ;;  %v1250_v38 = vadd.f32 %v1249_v51, %v1248_v10  ;;  %1985 = vpow2.f32 %v797_v26  ;;  %v526_v3 = vmax.f32 %v524_v25, %v525_v32  ;;  %v529_v9 = vsel %vm136_vm0, %v2847_v16, -inf }
 0x11a   :  { %1790 = vst [vmem:[%s3015_s1 + $0xa8] sm:$0xff] %v1758_v31  ;;  %v1461_v30 = vmul.f32 %v1976_v63, %v2819_v37  ;;  %v1245_v33 = vadd.f32 %v1244_v42, %v1243_v22  ;;  %v530_v41 = vrot.slane %v529_v9, 4  ;;  %v536_v56 = vsel %vm136_vm0, %v100_v50, -inf }
 0x11b   :  { %v1978_v7 = vpop.eup %1977  ;;  %v1251_v47 = vrot.slane %v1250_v38, 2  ;;  %v527_v1 = vrot.slane %v526_v3, 1  ;;  %v537_v49 = vrot.slane %v536_v56, 4  ;;  %v101_v44 = vcombine.high %v2859_v14, %v2859_v14 }
 0x11c   :  { %v1462_v55 = vmul.f32 %v1978_v7, %v2823_v15  ;;  %v1525_v34 = vsub.f32 2.0, %v1461_v30  ;;  %v1246_v20 = vrot.slane %v1245_v33, 1  ;;  %v531_v53 = vmax.f32 %v529_v9, %v530_v41 }
 0x11d   :  { %v1252_v28 = vadd.f32 %v1251_v47, %v1250_v38  ;;  %v528_v35 = vmax.f32 %v526_v3, %v527_v1  ;;  %v538_v11 = vmax.f32 %v536_v56, %v537_v49  ;;  %v543_v37 = vsel %vm136_vm0, %v2859_v14, -inf }
 0x11e   :  { %v2873_v6 = vpop.eup %1979  ;;  %v1526_v18 = vsub.f32 2.0, %v1462_v55  ;;  %v1589_v43 = vmul.f32 %v1976_v63, %v1525_v34  ;;  %v2875_v61 = vadd.f32 %v1246_v20, %v1245_v33  ;;  %v532_v57 = vrot.slane %v531_v53, 2 }
 0x11f   :  { %v1253_v62 = vrot.slane %v1252_v28, 1  ;;  %v866_v15 = vcombine.high %v2873_v6, %v2873_v6  ;;  %v1255_v39 = vsel %vm136_vm0, %v2873_v6, 0.0  ;;  %v676_v46 = vcombine.low %v521_v2, %v528_v35 }
 0x120   :  { %v1590_v17 = vmul.f32 %v1978_v7, %v1526_v18  ;;  %1987 = vrcp.f32 %v2875_v61  ;;  %v1256_v48 = vrot.slane %v1255_v39, 4  ;;  %v533_v58 = vmax.f32 %v531_v53, %v532_v57 }
 0x121   :  { %v2882_v54 = vadd.f32 %v1253_v62, %v1252_v28  ;;  %v1262_v59 = vsel %vm136_vm0, %v866_v15, 0.0  ;;  %v740_v29 = vsub.f32 %v2807_v0, %v676_v46  ;;  %v539_v27 = vrot.slane %v538_v11, 2 }
 0x122   :  { %v1695_v60 = vcombine.low %v1589_v43, %v1590_v17  ;;  %v1257_v8 = vadd.f32 %v1256_v48, %v1255_v39  ;;  %v1263_v40 = vrot.slane %v1262_v59, 4  ;;  %v534_v23 = vrot.slane %v533_v58, 1  ;;  %v2913_v43 = vld [vmem:[%s3014_s0 + $0xf0] sm:$0xff] }
 0x123   :  { %v1982_v13 = vpop.eup %1981  ;;  %1989 = vrcp.f32 %v2882_v54  ;;  %v799_v45 = vmul.f32 1.442695, %v740_v29  ;;  %v540_v10 = vmax.f32 %v538_v11, %v539_v27  ;;  %v544_v12 = vrot.slane %v543_v37, 4 }
 0x124   :  { %v1759_v5 = vmul.f32 %v2783_v52, %v1695_v60  ;;  %v1463_v25 = vmul.f32 %v1982_v13, %v2840_v4  ;;  %v1258_v21 = vrot.slane %v1257_v8, 2  ;;  %v1264_v22 = vadd.f32 %v1263_v40, %v1262_v59 }
 0x125   :  { %v1984_v51 = vpop.eup %1983  ;;  %1991 = vpow2.f32 %v799_v45  ;;  %v535_v0 = vmax.f32 %v533_v58, %v534_v23  ;;  %v541_v26 = vrot.slane %v540_v10, 1  ;;  %v545_v2 = vmax.f32 %v543_v37, %v544_v12 }
 0x126   :  { %v2889_v32 = vpop.eup %1985  ;;  %1791 = vst [vmem:[%s3015_s1 + $0xb0] sm:$0xff] %v1759_v5  ;;  %v1464_v31 = vmul.f32 %v1984_v51, %v2849_v24  ;;  %v1527_v42 = vsub.f32 2.0, %v1463_v25  ;;  %v1259_v50 = vadd.f32 %v1258_v21, %v1257_v8  ;;  %v1265_v52 = vrot.slane %v1264_v22, 2 }
 0x127   :  { %v867_v4 = vcombine.high %v2889_v32, %v2889_v32  ;;  %v1269_v63 = vsel %vm136_vm0, %v2889_v32, 0.0  ;;  %v542_v38 = vmax.f32 %v540_v10, %v541_v26  ;;  %v546_v3 = vrot.slane %v545_v2, 2 }
 0x128   :  { %v1528_v9 = vsub.f32 2.0, %v1464_v31  ;;  %v1591_v30 = vmul.f32 %v1982_v13, %v1527_v42  ;;  %v1260_v33 = vrot.slane %v1259_v50, 1  ;;  %v1266_v41 = vadd.f32 %v1265_v52, %v1264_v22 }
 0x129   :  { %v1270_v56 = vrot.slane %v1269_v63, 4  ;;  %v1276_v7 = vsel %vm136_vm0, %v867_v4, 0.0  ;;  %v677_v47 = vcombine.low %v535_v0, %v542_v38  ;;  %v547_v24 = vmax.f32 %v545_v2, %v546_v3 }
 0x12a   :  { %v1592_v1 = vmul.f32 %v1984_v51, %v1528_v9  ;;  %v2900_v49 = vadd.f32 %v1260_v33, %v1259_v50  ;;  %v1267_v55 = vrot.slane %v1266_v41, 1  ;;  %v1277_v34 = vrot.slane %v1276_v7, 4 }
 0x12b   :  { %v1271_v20 = vadd.f32 %v1270_v56, %v1269_v63  ;;  %v741_v53 = vsub.f32 %v2847_v16, %v677_v47  ;;  %v548_v28 = vrot.slane %v547_v24, 1  ;;  %v550_v35 = vsel %vm136_vm0, %v101_v44, -inf  ;;  %v2920_v44 = vld [vmem:[%s3014_s0 + $0xf8] sm:$0xff] }
 0x12c   :  { %v1696_v11 = vcombine.low %v1591_v30, %v1592_v1  ;;  %v2907_v37 = vadd.f32 %v1267_v55, %v1266_v41  ;;  %1993 = vrcp.f32 %v2900_v49  ;;  %v1278_v18 = vadd.f32 %v1277_v34, %v1276_v7 }
 0x12d   :  { %v1988_v57 = vpop.eup %1987  ;;  %v1272_v62 = vrot.slane %v1271_v20, 2  ;;  %v801_v16 = vmul.f32 1.442695, %v741_v53  ;;  %v2915_v15 = vmax.f32 %v547_v24, %v548_v28  ;;  %v551_v39 = vrot.slane %v550_v35, 4 }
 0x12e   :  { %v1760_v46 = vmul.f32 %v2813_v36, %v1696_v11  ;;  %v1465_v17 = vmul.f32 %v1988_v57, %v2875_v61  ;;  %1995 = vrcp.f32 %v2907_v37  ;;  %v1279_v48 = vrot.slane %v1278_v18, 2 }
 0x12f   :  { %v1273_v58 = vadd.f32 %v1272_v62, %v1271_v20  ;;  %1997 = vpow2.f32 %v801_v16  ;;  %v552_v59 = vmax.f32 %v550_v35, %v551_v39  ;;  %v102_v29 = vcombine.high %v2913_v43, %v2913_v43 }
 0x130   :  { %v1990_v27 = vpop.eup %1989  ;;  %1792 = vst [vmem:[%s3015_s1 + $0xb8] sm:$0xff] %v1760_v46  ;;  %v1529_v60 = vsub.f32 2.0, %v1465_v17  ;;  %v1280_v8 = vadd.f32 %v1279_v48, %v1278_v18  ;;  %v557_v36 = vsel %vm136_vm0, %v2913_v43, -inf  ;;  %v103_v61 = vcombine.high %v2920_v44, %v2920_v44 }
 0x131   :  { %v1466_v40 = vmul.f32 %v1990_v27, %v2882_v54  ;;  %v1274_v23 = vrot.slane %v1273_v58, 1  ;;  %v553_v13 = vrot.slane %v552_v59, 2  ;;  %v558_v45 = vrot.slane %v557_v36, 4 }
 0x132   :  { %v2935_v10 = vpop.eup %1991  ;;  %v1593_v12 = vmul.f32 %v1988_v57, %v1529_v60  ;;  %v1281_v5 = vrot.slane %v1280_v8, 1  ;;  %v564_v25 = vsel %vm136_vm0, %v102_v29, -inf  ;;  %v571_v21 = vsel %vm136_vm0, %v2920_v44, -inf }
 0x133   :  { %v1530_v22 = vsub.f32 2.0, %v1466_v40  ;;  %v2940_v51 = vadd.f32 %v1274_v23, %v1273_v58  ;;  %v868_v0 = vcombine.high %v2935_v10, %v2935_v10  ;;  %v1283_v54 = vsel %vm136_vm0, %v2935_v10, 0.0 }
 0x134   :  { %v2946_v26 = vadd.f32 %v1281_v5, %v1280_v8  ;;  %v1284_v2 = vrot.slane %v1283_v54, 4  ;;  %v554_v31 = vmax.f32 %v552_v59, %v553_v13  ;;  %v559_v42 = vmax.f32 %v557_v36, %v558_v45 }
 0x135   :  { %v1594_v50 = vmul.f32 %v1990_v27, %v1530_v22  ;;  %1999 = vrcp.f32 %v2940_v51  ;;  %v1290_v52 = vsel %vm136_vm0, %v868_v0, 0.0  ;;  %v565_v4 = vrot.slane %v564_v25, 4 }
 0x136   :  { %2001 = vrcp.f32 %v2946_v26  ;;  %v1285_v63 = vadd.f32 %v1284_v2, %v1283_v54  ;;  %v1291_v38 = vrot.slane %v1290_v52, 4  ;;  %v555_v3 = vrot.slane %v554_v31, 1 }
 0x137   :  { %v1697_v9 = vcombine.low %v1593_v12, %v1594_v50  ;;  %v560_v30 = vrot.slane %v559_v42, 2  ;;  %v566_v33 = vmax.f32 %v564_v25, %v565_v4  ;;  %v572_v41 = vrot.slane %v571_v21, 4 }
 0x138   :  { %v1286_v56 = vrot.slane %v1285_v63, 2  ;;  %v1292_v7 = vadd.f32 %v1291_v38, %v1290_v52  ;;  %v556_v47 = vmax.f32 %v554_v31, %v555_v3  ;;  %v578_v24 = vsel %vm136_vm0, %v103_v61, -inf }
 0x139   :  { %v1994_v1 = vpop.eup %1993  ;;  %v1761_v55 = vmul.f32 %v2834_v19, %v1697_v9  ;;  %v561_v34 = vmax.f32 %v559_v42, %v560_v30  ;;  %v567_v20 = vrot.slane %v566_v33, 2  ;;  %v573_v53 = vmax.f32 %v571_v21, %v572_v41 }
 0x13a   :  { %v1467_v28 = vmul.f32 %v1994_v1, %v2900_v49  ;;  %v1287_v35 = vadd.f32 %v1286_v56, %v1285_v63  ;;  %v1293_v11 = vrot.slane %v1292_v7, 2  ;;  %v678_v18 = vcombine.low %v2915_v15, %v556_v47 }
 0x13b   :  { %v1996_v57 = vpop.eup %1995  ;;  %1793 = vst [vmem:[%s3015_s1 + $0xc0] sm:$0xff] %v1761_v55  ;;  %v562_v62 = vrot.slane %v561_v34, 1  ;;  %v568_v16 = vmax.f32 %v566_v33, %v567_v20  ;;  %v574_v39 = vrot.slane %v573_v53, 2  ;;  %v579_v46 = vrot.slane %v578_v24, 4 }
 0x13c   :  { %v2958_v17 = vpop.eup %1997  ;;  %v1468_v19 = vmul.f32 %v1996_v57, %v2907_v37  ;;  %v1531_v48 = vsub.f32 2.0, %v1467_v28  ;;  %v1288_v58 = vrot.slane %v1287_v35, 1  ;;  %v1294_v49 = vadd.f32 %v1293_v11, %v1292_v7 }
 0x13d   :  { %v869_v59 = vcombine.high %v2958_v17, %v2958_v17  ;;  %v1297_v15 = vsel %vm136_vm0, %v2958_v17, 0.0  ;;  %v742_v29 = vsub.f32 %v2859_v14, %v678_v18  ;;  %v563_v27 = vmax.f32 %v561_v34, %v562_v62 }
 0x13e   :  { %v1532_v60 = vsub.f32 2.0, %v1468_v19  ;;  %v1595_v8 = vmul.f32 %v1994_v1, %v1531_v48  ;;  %v1289_v36 = vadd.f32 %v1288_v58, %v1287_v35  ;;  %v1295_v61 = vrot.slane %v1294_v49, 1 }
 0x13f   :  { %v1298_v40 = vrot.slane %v1297_v15, 4  ;;  %v1304_v23 = vsel %vm136_vm0, %v869_v59, 0.0  ;;  %v803_v37 = vmul.f32 1.442695, %v742_v29  ;;  %v569_v13 = vrot.slane %v568_v16, 1 }
 0x140   :  { %v1596_v45 = vmul.f32 %v1996_v57, %v1532_v60  ;;  %v1296_v12 = vadd.f32 %v1295_v61, %v1294_v49  ;;  %2003 = vrcp.f32 %v1289_v36  ;;  %v1305_v5 = vrot.slane %v1304_v23, 4 }
 0x141   :  { %v1299_v25 = vadd.f32 %v1298_v40, %v1297_v15  ;;  %2005 = vpow2.f32 %v803_v37  ;;  %v570_v21 = vmax.f32 %v568_v16, %v569_v13  ;;  %v575_v22 = vmax.f32 %v573_v53, %v574_v39 }
 0x142   :  { %v2000_v0 = vpop.eup %1999  ;;  %v1698_v14 = vcombine.low %v1595_v8, %v1596_v45  ;;  %2007 = vrcp.f32 %v1296_v12  ;;  %v1306_v54 = vadd.f32 %v1305_v5, %v1304_v23  ;;  %v580_v2 = vmax.f32 %v578_v24, %v579_v46 }
 0x143   :  { %v2002_v31 = vpop.eup %2001  ;;  %v1469_v42 = vmul.f32 %v2000_v0, %v2940_v51  ;;  %v1300_v50 = vrot.slane %v1299_v25, 2  ;;  %v679_v52 = vcombine.low %v563_v27, %v570_v21  ;;  %v576_v4 = vrot.slane %v575_v22, 1 }
 0x144   :  { %v1762_v63 = vmul.f32 %v2873_v6, %v1698_v14  ;;  %v1470_v38 = vmul.f32 %v2002_v31, %v2946_v26  ;;  %v1307_v3 = vrot.slane %v1306_v54, 2  ;;  %v581_v9 = vrot.slane %v580_v2, 2 }
 0x145   :  { %v1533_v30 = vsub.f32 2.0, %v1469_v42  ;;  %v1301_v33 = vadd.f32 %v1300_v50, %v1299_v25  ;;  %v743_v41 = vsub.f32 %v2913_v43, %v679_v52  ;;  %v577_v34 = vmax.f32 %v575_v22, %v576_v4 }
 0x146   :  { %1794 = vst [vmem:[%s3015_s1 + $0xc8] sm:$0xff] %v1762_v63  ;;  %v1534_v56 = vsub.f32 2.0, %v1470_v38  ;;  %v1308_v7 = vadd.f32 %v1307_v3, %v1306_v54  ;;  %v582_v51 = vmax.f32 %v580_v2, %v581_v9 }
 0x147   :  { %v1597_v47 = vmul.f32 %v2000_v0, %v1533_v30  ;;  %v1302_v24 = vrot.slane %v1301_v33, 1  ;;  %v805_v1 = vmul.f32 1.442695, %v743_v41 }
 0x148   :  { %v1598_v55 = vmul.f32 %v2002_v31, %v1534_v56  ;;  %v1309_v6 = vrot.slane %v1308_v7, 1  ;;  %v583_v26 = vrot.slane %v582_v51, 1 }
 0x149   :  { %v1303_v20 = vadd.f32 %v1302_v24, %v1301_v33  ;;  %2009 = vpow2.f32 %v805_v1 }
 0x14a   :  { %v1699_v53 = vcombine.low %v1597_v47, %v1598_v55  ;;  %v1310_v28 = vadd.f32 %v1309_v6, %v1308_v7  ;;  %v584_v35 = vmax.f32 %v582_v51, %v583_v26 }
 0x14b   :  { %2011 = vrcp.f32 %v1303_v20 }
 0x14c   :  { %v1763_v43 = vmul.f32 %v2889_v32, %v1699_v53  ;;  %2013 = vrcp.f32 %v1310_v28  ;;  %v680_v11 = vcombine.low %v577_v34, %v584_v35 }
 0x14d   :  { %v2004_v18 = vpop.eup %2003 }
 0x14e   :  { %v2975_v57 = vpop.eup %2005  ;;  %1795 = vst [vmem:[%s3015_s1 + $0xd0] sm:$0xff] %v1763_v43  ;;  %v1471_v62 = vmul.f32 %v2004_v18, %v1289_v36  ;;  %v744_v16 = vsub.f32 %v2920_v44, %v680_v11 }
 0x14f   :  { %v2008_v39 = vpop.eup %2007  ;;  %v870_v46 = vcombine.high %v2975_v57, %v2975_v57  ;;  %v1311_v19 = vsel %vm136_vm0, %v2975_v57, 0.0 }
 0x150   :  { %v1472_v32 = vmul.f32 %v2008_v39, %v1296_v12  ;;  %v1535_v48 = vsub.f32 2.0, %v1471_v62  ;;  %v1312_v58 = vrot.slane %v1311_v19, 4  ;;  %v807_v49 = vmul.f32 1.442695, %v744_v16 }
 0x151   :  { %v1318_v59 = vsel %vm136_vm0, %v870_v46, 0.0 }
 0x152   :  { %v1536_v15 = vsub.f32 2.0, %v1472_v32  ;;  %v1599_v29 = vmul.f32 %v2004_v18, %v1535_v48  ;;  %v1313_v27 = vadd.f32 %v1312_v58, %v1311_v19  ;;  %v1319_v60 = vrot.slane %v1318_v59, 4 }
 0x153   :  { %2015 = vpow2.f32 %v807_v49 }
 0x154   :  { %v1600_v8 = vmul.f32 %v2008_v39, %v1536_v15  ;;  %v1314_v44 = vrot.slane %v1313_v27, 2  ;;  %v1320_v36 = vadd.f32 %v1319_v60, %v1318_v59 }
 0x156   :  { %v2986_v61 = vpop.eup %2009  ;;  %v1700_v40 = vcombine.low %v1599_v29, %v1600_v8  ;;  %v1315_v23 = vadd.f32 %v1314_v44, %v1313_v27  ;;  %v1321_v37 = vrot.slane %v1320_v36, 2 }
 0x157   :  { %v871_v13 = vcombine.high %v2986_v61, %v2986_v61  ;;  %v1325_v45 = vsel %vm136_vm0, %v2986_v61, 0.0 }
 0x158   :  { %v2012_v12 = vpop.eup %2011  ;;  %v1764_v5 = vmul.f32 %v2935_v10, %v1700_v40  ;;  %v1316_v25 = vrot.slane %v1315_v23, 1  ;;  %v1322_v21 = vadd.f32 %v1321_v37, %v1320_v36  ;;  %v1326_v22 = vrot.slane %v1325_v45, 4 }
 0x159   :  { %v2014_v0 = vpop.eup %2013  ;;  %v1473_v14 = vmul.f32 %v2012_v12, %v1303_v20  ;;  %v1332_v54 = vsel %vm136_vm0, %v871_v13, 0.0 }
 0x15a   :  { %1796 = vst [vmem:[%s3015_s1 + $0xd8] sm:$0xff] %v1764_v5  ;;  %v1474_v2 = vmul.f32 %v2014_v0, %v1310_v28  ;;  %v1317_v31 = vadd.f32 %v1316_v25, %v1315_v23  ;;  %v1323_v42 = vrot.slane %v1322_v21, 1  ;;  %v1327_v50 = vadd.f32 %v1326_v22, %v1325_v45 }
 0x15b   :  { %v1537_v52 = vsub.f32 2.0, %v1473_v14  ;;  %v1333_v4 = vrot.slane %v1332_v54, 4 }
 0x15c   :  { %v1538_v63 = vsub.f32 2.0, %v1474_v2  ;;  %v1324_v38 = vadd.f32 %v1323_v42, %v1322_v21  ;;  %2017 = vrcp.f32 %v1317_v31  ;;  %v1328_v10 = vrot.slane %v1327_v50, 2 }
 0x15d   :  { %v1601_v3 = vmul.f32 %v2012_v12, %v1537_v52  ;;  %v1334_v9 = vadd.f32 %v1333_v4, %v1332_v54 }
 0x15e   :  { %v1602_v30 = vmul.f32 %v2014_v0, %v1538_v63  ;;  %2019 = vrcp.f32 %v1324_v38  ;;  %v1329_v33 = vadd.f32 %v1328_v10, %v1327_v50 }
 0x15f   :  { %v1335_v41 = vrot.slane %v1334_v9, 2 }
 0x160   :  { %v2016_v56 = vpop.eup %2015  ;;  %v1701_v7 = vcombine.low %v1601_v3, %v1602_v30  ;;  %v1330_v51 = vrot.slane %v1329_v33, 1 }
 0x161   :  { %v1336_v47 = vadd.f32 %v1335_v41, %v1334_v9  ;;  %v872_v24 = vcombine.high %v2016_v56, %v2016_v56  ;;  %v1339_v1 = vsel %vm136_vm0, %v2016_v56, 0.0 }
 0x162   :  { %v1765_v55 = vmul.f32 %v2958_v17, %v1701_v7  ;;  %v1331_v6 = vadd.f32 %v1330_v51, %v1329_v33  ;;  %v1340_v34 = vrot.slane %v1339_v1, 4 }
 0x163   :  { %v1337_v26 = vrot.slane %v1336_v47, 1  ;;  %v1346_v20 = vsel %vm136_vm0, %v872_v24, 0.0 }
 0x164   :  { %1797 = vst [vmem:[%s3015_s1 + $0xe0] sm:$0xff] %v1765_v55  ;;  %2021 = vrcp.f32 %v1331_v6  ;;  %v1341_v53 = vadd.f32 %v1340_v34, %v1339_v1  ;;  %v1347_v28 = vrot.slane %v1346_v20, 4 }
 0x165   :  { %v1338_v35 = vadd.f32 %v1337_v26, %v1336_v47 }
 0x166   :  { %v1342_v43 = vrot.slane %v1341_v53, 2  ;;  %v1348_v11 = vadd.f32 %v1347_v28, %v1346_v20 }
 0x167   :  { %2023 = vrcp.f32 %v1338_v35 }
 0x168   :  { %v1343_v18 = vadd.f32 %v1342_v43, %v1341_v53  ;;  %v1349_v62 = vrot.slane %v1348_v11, 2 }
 0x169   :  { %v2018_v16 = vpop.eup %2017 }
 0x16a   :  { %v1475_v17 = vmul.f32 %v2018_v16, %v1317_v31  ;;  %v1344_v39 = vrot.slane %v1343_v18, 1  ;;  %v1350_v46 = vadd.f32 %v1349_v62, %v1348_v11 }
 0x16b   :  { %v2020_v19 = vpop.eup %2019 }
 0x16c   :  { %v1476_v32 = vmul.f32 %v2020_v19, %v1324_v38  ;;  %v1539_v48 = vsub.f32 2.0, %v1475_v17  ;;  %v1345_v58 = vadd.f32 %v1344_v39, %v1343_v18  ;;  %v1351_v49 = vrot.slane %v1350_v46, 1 }
 0x16e   :  { %v1540_v59 = vsub.f32 2.0, %v1476_v32  ;;  %v1603_v15 = vmul.f32 %v2018_v16, %v1539_v48  ;;  %v1352_v29 = vadd.f32 %v1351_v49, %v1350_v46  ;;  %2025 = vrcp.f32 %v1345_v58 }
 0x170   :  { %v1604_v27 = vmul.f32 %v2020_v19, %v1540_v59  ;;  %2027 = vrcp.f32 %v1352_v29 }
 0x171   :  { %v2022_v60 = vpop.eup %2021 }
 0x172   :  { %v1702_v8 = vcombine.low %v1603_v15, %v1604_v27  ;;  %v1477_v44 = vmul.f32 %v2022_v60, %v1331_v6 }
 0x174   :  { %v2024_v36 = vpop.eup %2023  ;;  %v1766_v40 = vmul.f32 %v2975_v57, %v1702_v8  ;;  %v1541_v23 = vsub.f32 2.0, %v1477_v44 }
 0x175   :  { %v1478_v37 = vmul.f32 %v2024_v36, %v1338_v35 }
 0x176   :  { %1798 = vst [vmem:[%s3015_s1 + $0xe8] sm:$0xff] %v1766_v40  ;;  %v1605_v45 = vmul.f32 %v2022_v60, %v1541_v23 }
 0x177   :  { %v1542_v13 = vsub.f32 2.0, %v1478_v37 }
 0x179   :  { %v1606_v12 = vmul.f32 %v2024_v36, %v1542_v13 }
 0x17b   :  { %v2026_v5 = vpop.eup %2025  ;;  %v1703_v25 = vcombine.low %v1605_v45, %v1606_v12 }
 0x17c   :  { %v1479_v21 = vmul.f32 %v2026_v5, %v1345_v58 }
 0x17d   :  { %v2028_v22 = vpop.eup %2027  ;;  %v1767_v0 = vmul.f32 %v2986_v61, %v1703_v25 }
 0x17e   :  { %v1480_v14 = vmul.f32 %v2028_v22, %v1352_v29  ;;  %v1543_v54 = vsub.f32 2.0, %v1479_v21 }
 0x17f   :  { %1799 = vst [vmem:[%s3015_s1 + $0xf0] sm:$0xff] %v1767_v0 }
 0x180   :  { %v1544_v57 = vsub.f32 2.0, %v1480_v14  ;;  %v1607_v2 = vmul.f32 %v2026_v5, %v1543_v54 }
 0x182   :  { %v1608_v31 = vmul.f32 %v2028_v22, %v1544_v57 }
 0x184   :  { %v1704_v42 = vcombine.low %v1607_v2, %v1608_v31 }
 0x186   :  { %v1768_v50 = vmul.f32 %v2016_v56, %v1704_v42 }
 0x188   :  { %1800 = vst [vmem:[%s3015_s1 + $0xf8] sm:$0xff] %v1768_v50 }

</bundles_post_ra>
